<compile_context>
chip_gen: v7x
topology: tpu7x:2x2x1
jax: 0.10.0
libtpu: 0.0.40
codegen_flags: <defaults>
</compile_context>

<pallas_src>
import functools
import math

import jax
import jax.numpy as jnp
from jax.experimental import pallas as pl
from jax.experimental.pallas import tpu as pltpu


_COMPILER_PARAMS = pltpu.CompilerParams(
    dimension_semantics=("parallel",),
    vmem_limit_bytes=32 * 1024 * 1024,
)


# ----------------------------------------------------------------------------
# Pallas kernels
# ----------------------------------------------------------------------------
def _embed_kernel(tok_ref, w_ref, b_ref, pe_ref, o_ref):
    # embedder matmul + bias + positional encoding, fused.  One batch element per step.
    tok = tok_ref[0].astype(jnp.float32)                      # (S, C)
    y = jnp.dot(tok, w_ref[...], preferred_element_type=jnp.float32)  # (S, D)
    y = y + b_ref[...] + pe_ref[...]
    o_ref[0] = y.astype(o_ref.dtype)


def _layernorm(z, g, b, eps):
    mean = jnp.mean(z, axis=-1, keepdims=True)
    zc = z - mean
    var = jnp.mean(zc * zc, axis=-1, keepdims=True)
    return zc * jax.lax.rsqrt(var + eps) * g + b


def _layer_kernel(x_ref, wqkv_ref, bqkv_ref, wo_ref, bo_ref,
                  ln1g_ref, ln1b_ref,
                  w1_ref, b1_ref, w2_ref, b2_ref,
                  ln2g_ref, ln2b_ref,
                  o_ref, *, nhead, eps):
    # Entire post-norm encoder layer for one batch element, fully fused in VMEM.
    x = x_ref[0]                                              # (S, D) bf16
    S, D = x.shape
    dh = D // nhead
    scale = 1.0 / math.sqrt(dh)
    xf = x.astype(jnp.float32)

    # --- fused QKV projection: a single MXU matmul (D, 3D) ---
    qkv = jnp.dot(x, wqkv_ref[...], preferred_element_type=jnp.float32)
    qkv = qkv + bqkv_ref[...]                                 # (S, 3D) f32

    # --- multi-head attention; head split + out-projection fused in-kernel ---
    attn = None
    for h in range(nhead):
        q_h = qkv[:, h * dh:(h + 1) * dh] * scale             # (S, dh)
        k_h = qkv[:, D + h * dh:D + (h + 1) * dh]             # (S, dh)
        v_h = qkv[:, 2 * D + h * dh:2 * D + (h + 1) * dh]     # (S, dh)
        # scores = q @ k^T (bf16 operands, f32 accumulate)
        s = jax.lax.dot_general(
            q_h.astype(jnp.bfloat16), k_h.astype(jnp.bfloat16),
            dimension_numbers=(((1,), (1,)), ((), ())),
            preferred_element_type=jnp.float32)               # (S, S)
        m = jnp.max(s, axis=-1, keepdims=True)
        p = jnp.exp(s - m)
        denom = jnp.sum(p, axis=-1, keepdims=True)
        p = p * pl.reciprocal(denom, approx=True)             # EUP reciprocal
        o_h = jnp.dot(p.astype(jnp.bfloat16), v_h.astype(jnp.bfloat16),
                      preferred_element_type=jnp.float32)     # (S, dh)
        # out-projection fused per head: rows of wo (sublane-aligned slice)
        contrib = jnp.dot(o_h.astype(jnp.bfloat16),
                          wo_ref[h * dh:(h + 1) * dh, :],
                          preferred_element_type=jnp.float32) # (S, D)
        attn = contrib if attn is None else attn + contrib
    attn = attn + bo_ref[...]

    # --- residual add + LayerNorm 1 (f32) ---
    x1 = _layernorm(xf + attn, ln1g_ref[...], ln1b_ref[...], eps)

    # --- FFN: w1 + ReLU + w2, fused ---
    h1 = jnp.dot(x1.astype(jnp.bfloat16), w1_ref[...],
                 preferred_element_type=jnp.float32) + b1_ref[...]
    h1 = jnp.maximum(h1, 0.0)
    h2 = jnp.dot(h1.astype(jnp.bfloat16), w2_ref[...],
                 preferred_element_type=jnp.float32) + b2_ref[...]

    # --- residual add + LayerNorm 2 ---
    x2 = _layernorm(x1 + h2, ln2g_ref[...], ln2b_ref[...], eps)
    o_ref[0] = x2.astype(o_ref.dtype)


def _head_kernel(x_ref, w_ref, b_ref, o_ref):
    y = jnp.dot(x_ref[0], w_ref[...], preferred_element_type=jnp.float32)
    o_ref[0] = (y + b_ref[...]).astype(o_ref.dtype)


# ----------------------------------------------------------------------------
# pallas_call wrappers
# ----------------------------------------------------------------------------
def embed_tokens(tokens, w, b, pe):
    N, S, C = tokens.shape
    D = w.shape[1]
    return pl.pallas_call(
        _embed_kernel,
        out_shape=jax.ShapeDtypeStruct((N, S, D), jnp.bfloat16),
        grid_spec=pltpu.PrefetchScalarGridSpec(
            num_scalar_prefetch=0,
            grid=(N,),
            in_specs=[
                pl.BlockSpec((1, S, C), lambda i: (i, 0, 0)),
                pl.BlockSpec((C, D), lambda i: (0, 0)),
                pl.BlockSpec((1, D), lambda i: (0, 0)),
                pl.BlockSpec((S, D), lambda i: (0, 0)),
            ],
            out_specs=pl.BlockSpec((1, S, D), lambda i: (i, 0, 0)),
        ),
        compiler_params=_COMPILER_PARAMS,
    )(tokens, w, b, pe)


def encoder_layer(x, p, *, nhead, eps):
    N, S, D = x.shape
    dff = p["w1"].shape[1]
    kern = functools.partial(_layer_kernel, nhead=nhead, eps=eps)
    return pl.pallas_call(
        kern,
        out_shape=jax.ShapeDtypeStruct((N, S, D), jnp.bfloat16),
        grid_spec=pltpu.PrefetchScalarGridSpec(
            num_scalar_prefetch=0,
            grid=(N,),
            in_specs=[
                pl.BlockSpec((1, S, D), lambda i: (i, 0, 0)),   # x
                pl.BlockSpec((D, 3 * D), lambda i: (0, 0)),     # wqkv
                pl.BlockSpec((1, 3 * D), lambda i: (0, 0)),     # bqkv
                pl.BlockSpec((D, D), lambda i: (0, 0)),         # wo
                pl.BlockSpec((1, D), lambda i: (0, 0)),         # bo
                pl.BlockSpec((1, D), lambda i: (0, 0)),         # ln1_g
                pl.BlockSpec((1, D), lambda i: (0, 0)),         # ln1_b
                pl.BlockSpec((D, dff), lambda i: (0, 0)),       # w1
                pl.BlockSpec((1, dff), lambda i: (0, 0)),       # b1
                pl.BlockSpec((dff, D), lambda i: (0, 0)),       # w2
                pl.BlockSpec((1, D), lambda i: (0, 0)),         # b2
                pl.BlockSpec((1, D), lambda i: (0, 0)),         # ln2_g
                pl.BlockSpec((1, D), lambda i: (0, 0)),         # ln2_b
            ],
            out_specs=pl.BlockSpec((1, S, D), lambda i: (i, 0, 0)),
        ),
        compiler_params=_COMPILER_PARAMS,
    )(x, p["wqkv"], p["bqkv"], p["wo"], p["bo"],
      p["ln1_g"], p["ln1_b"],
      p["w1"], p["b1"], p["w2"], p["b2"],
      p["ln2_g"], p["ln2_b"])


def classifier_head(x, w, b):
    N, S, D = x.shape
    num_classes = w.shape[1]
    return pl.pallas_call(
        _head_kernel,
        out_shape=jax.ShapeDtypeStruct((N, S, num_classes), jnp.float32),
        grid_spec=pltpu.PrefetchScalarGridSpec(
            num_scalar_prefetch=0,
            grid=(N,),
            in_specs=[
                pl.BlockSpec((1, S, D), lambda i: (i, 0, 0)),
                pl.BlockSpec((D, num_classes), lambda i: (0, 0)),
                pl.BlockSpec((1, num_classes), lambda i: (0, 0)),
            ],
            out_specs=pl.BlockSpec((1, S, num_classes), lambda i: (i, 0, 0)),
        ),
        compiler_params=_COMPILER_PARAMS,
    )(x, w, b)


# ----------------------------------------------------------------------------
# Parameters (deterministic, synthetic) and forward
# ----------------------------------------------------------------------------
def _w(key, shape, scale=0.02, dtype=jnp.bfloat16):
    return (scale * jax.random.normal(key, shape, dtype=jnp.float32)).astype(dtype)


def init_params(key, *, in_dim, d_model, nhead, num_layers, dff, num_classes):
    keys = jax.random.split(key, 2 + num_layers)
    params = {
        # embedder: nn.Linear(chunk_size*chunk_size*3, d_model)   (weights stored (in, out))
        "embed_w": _w(keys[0], (in_dim, d_model), dtype=jnp.float32),
        "embed_b": jnp.zeros((1, d_model), jnp.float32),
        # output_layer: nn.Linear(d_model, num_classes)
        "out_w": _w(keys[1], (d_model, num_classes)),
        "out_b": jnp.zeros((1, num_classes), jnp.float32),
        "layers": [],
    }
    for l in range(num_layers):
        lk = jax.random.split(keys[2 + l], 4)
        params["layers"].append({
            "wqkv": _w(lk[0], (d_model, 3 * d_model)),          # fused q|k|v
            "bqkv": jnp.zeros((1, 3 * d_model), jnp.float32),
            "wo": _w(lk[1], (d_model, d_model)),
            "bo": jnp.zeros((1, d_model), jnp.float32),
            "w1": _w(lk[2], (d_model, dff)),
            "b1": jnp.zeros((1, dff), jnp.float32),
            "w2": _w(lk[3], (dff, d_model)),
            "b2": jnp.zeros((1, d_model), jnp.float32),
            "ln1_g": jnp.ones((1, d_model), jnp.float32),
            "ln1_b": jnp.zeros((1, d_model), jnp.float32),
            "ln2_g": jnp.ones((1, d_model), jnp.float32),
            "ln2_b": jnp.zeros((1, d_model), jnp.float32),
        })
    return params


def sinusoidal_pos_enc(S, D):
    pos = jnp.arange(S, dtype=jnp.float32)[:, None]
    i = jnp.arange(D // 2, dtype=jnp.float32)[None, :]
    angles = pos / jnp.power(10000.0, 2.0 * i / D)
    pe = jnp.zeros((S, D), jnp.float32)
    pe = pe.at[:, 0::2].set(jnp.sin(angles))
    pe = pe.at[:, 1::2].set(jnp.cos(angles))
    return pe


def vision_transformer_forward(params, images, masks, *, d_model, nhead, num_layers,
                               layer_norm_eps=1e-5):
    # `masks` is accepted but unused — matching the PyTorch forward, which ignores it.
    del masks
    N, C, H, W = images.shape
    # model_in = images.transpose(1, -1)  ->  (N, W, H, C)
    model_in = jnp.transpose(images, (0, 3, 2, 1)).astype(jnp.float32)
    S = W * H
    tokens = model_in.reshape(N, S, C)

    # --- HAttnEncoder stand-in (see TODO at top) ---
    pe = sinusoidal_pos_enc(S, d_model)
    x = embed_tokens(tokens, params["embed_w"], params["embed_b"], pe)   # (N, S, D) bf16

    for l in range(num_layers):
        x = encoder_layer(x, params["layers"][l], nhead=nhead, eps=layer_norm_eps)

    # output_layer: nn.Linear(d_model, num_classes) applied to every token
    return classifier_head(x, params["out_w"], params["out_b"])          # (N, S, classes)


# ----------------------------------------------------------------------------
if __name__ == "__main__":
    # Small shapes consistent with the module (chunk_size=1 -> embedder in_dim = 3)
    N, C, H, W = 2, 3, 8, 8
    d_model, nhead, num_layers, dff, num_classes = 32, 4, 2, 64, 16
    chunk_size = 1

    key = jax.random.PRNGKey(0)
    k_img, k_param = jax.random.split(key)
    images = jax.random.normal(k_img, (N, C, H, W), dtype=jnp.float32)   # NCHW
    masks = jnp.ones((N, H, W), dtype=jnp.float32)                       # ignored by forward

    params = init_params(k_param, in_dim=chunk_size * chunk_size * 3, d_model=d_model,
                         nhead=nhead, num_layers=num_layers, dff=dff,
                         num_classes=num_classes)

    fwd = jax.jit(functools.partial(vision_transformer_forward,
                                    d_model=d_model, nhead=nhead,
                                    num_layers=num_layers))
    out = fwd(params, images, masks)
    out = jax.block_until_ready(out)
    assert out.shape == (N, H * W, num_classes)
    assert bool(jnp.all(jnp.isfinite(out)))
    print("KERNEL_OK")
</pallas_src>

<mosaic_0001>
module attributes {stable_mosaic.version = 11 : i64} {
  func.func @_embed_kernel(%arg0: i32, %arg1: memref<1x64x3xf32, #tpu.memory_space<vmem>>, %arg2: memref<3x32xf32, #tpu.memory_space<vmem>>, %arg3: memref<1x32xf32, #tpu.memory_space<vmem>>, %arg4: memref<64x32xf32, #tpu.memory_space<vmem>>, %arg5: memref<1x64x32xbf16, #tpu.memory_space<vmem>>) attributes {dimension_semantics = [#tpu.dimension_semantics<parallel>], iteration_bounds = array<i64: 2>, scalar_prefetch = 0 : i64, scratch_operands = 0 : i64, tpu.core_type = #tpu.core_type<tc>, window_params = [{transform_indices = @transform_0, window_bounds = array<i64: 1, 64, 3>}, {pipeline_mode = #tpu.pipeline_mode<synchronous>, transform_indices = @transform_1, window_bounds = array<i64: 3, 32>}, {pipeline_mode = #tpu.pipeline_mode<synchronous>, transform_indices = @transform_2, window_bounds = array<i64: 1, 32>}, {pipeline_mode = #tpu.pipeline_mode<synchronous>, transform_indices = @transform_3, window_bounds = array<i64: 64, 32>}, {transform_indices = @transform_4, window_bounds = array<i64: 1, 64, 32>}]} {
    %c0 = arith.constant 0 : index
    %c0_0 = arith.constant 0 : index
    %c0_1 = arith.constant 0 : index
    %0 = vector.load %arg1[%c0, %c0_0, %c0_1] : memref<1x64x3xf32, #tpu.memory_space<vmem>>, vector<1x64x3xf32>
    %1 = vector.shape_cast %0 : vector<1x64x3xf32> to vector<64x3xf32>
    %c0_2 = arith.constant 0 : index
    %c0_3 = arith.constant 0 : index
    %2 = vector.load %arg2[%c0_2, %c0_3] : memref<3x32xf32, #tpu.memory_space<vmem>>, vector<3x32xf32>
    %cst = arith.constant dense<0.000000e+00> : vector<64x32xf32>
    %3 = tpu.matmul %1, %2, %cst {dimension_numbers = #tpu.dot_dimension_numbers<[1], [0], [0], [1], [0, 0, 1, 1], [], []>} : vector<64x3xf32>, vector<3x32xf32>, vector<64x32xf32> -> vector<64x32xf32>
    %c0_4 = arith.constant 0 : index
    %c0_5 = arith.constant 0 : index
    %4 = vector.load %arg3[%c0_4, %c0_5] : memref<1x32xf32, #tpu.memory_space<vmem>>, vector<1x32xf32>
    %5 = vector.broadcast %4 : vector<1x32xf32> to vector<64x32xf32>
    %6 = arith.addf %3, %5 : vector<64x32xf32>
    %c0_6 = arith.constant 0 : index
    %c0_7 = arith.constant 0 : index
    %7 = vector.load %arg4[%c0_6, %c0_7] : memref<64x32xf32, #tpu.memory_space<vmem>>, vector<64x32xf32>
    %8 = arith.addf %6, %7 : vector<64x32xf32>
    %9 = arith.truncf %8 : vector<64x32xf32> to vector<64x32xbf16>
    %c0_8 = arith.constant 0 : index
    %c0_9 = arith.constant 0 : index
    %c0_10 = arith.constant 0 : index
    %10 = vector.load %arg5[%c0_8, %c0_9, %c0_10] : memref<1x64x32xbf16, #tpu.memory_space<vmem>>, vector<1x64x32xbf16>
    %11 = vector.shape_cast %10 : vector<1x64x32xbf16> to vector<64x32xbf16>
    %12 = vector.shape_cast %9 : vector<64x32xbf16> to vector<1x64x32xbf16>
    tpu.vector_store %arg5[%c0_8, %c0_9, %c0_10], %12 {strides = array<i32>} : memref<1x64x32xbf16, #tpu.memory_space<vmem>>, vector<1x64x32xbf16>,
    return
  }
  func.func @transform_0(%arg0: i32) -> (i32, i32, i32) {
    %c0_i32 = arith.constant 0 : i32
    %c0_i32_0 = arith.constant 0 : i32
    %c0_i32_1 = arith.constant 0 : i32
    return %arg0, %c0_i32, %c0_i32_0 : i32, i32, i32
  }
  func.func @transform_1(%arg0: i32) -> (i32, i32) {
    %c0_i32 = arith.constant 0 : i32
    %c0_i32_0 = arith.constant 0 : i32
    %c0_i32_1 = arith.constant 0 : i32
    return %c0_i32, %c0_i32_0 : i32, i32
  }
  func.func @transform_2(%arg0: i32) -> (i32, i32) {
    %c0_i32 = arith.constant 0 : i32
    %c0_i32_0 = arith.constant 0 : i32
    %c0_i32_1 = arith.constant 0 : i32
    return %c0_i32, %c0_i32_0 : i32, i32
  }
  func.func @transform_3(%arg0: i32) -> (i32, i32) {
    %c0_i32 = arith.constant 0 : i32
    %c0_i32_0 = arith.constant 0 : i32
    %c0_i32_1 = arith.constant 0 : i32
    return %c0_i32, %c0_i32_0 : i32, i32
  }
  func.func @transform_4(%arg0: i32) -> (i32, i32, i32) {
    %c0_i32 = arith.constant 0 : i32
    %c0_i32_0 = arith.constant 0 : i32
    %c0_i32_1 = arith.constant 0 : i32
    return %arg0, %c0_i32, %c0_i32_0 : i32, i32, i32
  }
}

module attributes {stable_mosaic.version = 11 : i64} {
  func.func @_layer_kernel(%arg0: i32, %arg1: memref<1x64x32xbf16, #tpu.memory_space<vmem>>, %arg2: memref<32x96xbf16, #tpu.memory_space<vmem>>, %arg3: memref<1x96xf32, #tpu.memory_space<vmem>>, %arg4: memref<32x32xbf16, #tpu.memory_space<vmem>>, %arg5: memref<1x32xf32, #tpu.memory_space<vmem>>, %arg6: memref<1x32xf32, #tpu.memory_space<vmem>>, %arg7: memref<1x32xf32, #tpu.memory_space<vmem>>, %arg8: memref<32x64xbf16, #tpu.memory_space<vmem>>, %arg9: memref<1x64xf32, #tpu.memory_space<vmem>>, %arg10: memref<64x32xbf16, #tpu.memory_space<vmem>>, %arg11: memref<1x32xf32, #tpu.memory_space<vmem>>, %arg12: memref<1x32xf32, #tpu.memory_space<vmem>>, %arg13: memref<1x32xf32, #tpu.memory_space<vmem>>, %arg14: memref<1x64x32xbf16, #tpu.memory_space<vmem>>) attributes {dimension_semantics = [#tpu.dimension_semantics<parallel>], iteration_bounds = array<i64: 2>, scalar_prefetch = 0 : i64, scratch_operands = 0 : i64, tpu.core_type = #tpu.core_type<tc>, window_params = [{transform_indices = @transform_0, window_bounds = array<i64: 1, 64, 32>}, {pipeline_mode = #tpu.pipeline_mode<synchronous>, transform_indices = @transform_1, window_bounds = array<i64: 32, 96>}, {pipeline_mode = #tpu.pipeline_mode<synchronous>, transform_indices = @transform_2, window_bounds = array<i64: 1, 96>}, {pipeline_mode = #tpu.pipeline_mode<synchronous>, transform_indices = @transform_3, window_bounds = array<i64: 32, 32>}, {pipeline_mode = #tpu.pipeline_mode<synchronous>, transform_indices = @transform_4, window_bounds = array<i64: 1, 32>}, {pipeline_mode = #tpu.pipeline_mode<synchronous>, transform_indices = @transform_5, window_bounds = array<i64: 1, 32>}, {pipeline_mode = #tpu.pipeline_mode<synchronous>, transform_indices = @transform_6, window_bounds = array<i64: 1, 32>}, {pipeline_mode = #tpu.pipeline_mode<synchronous>, transform_indices = @transform_7, window_bounds = array<i64: 32, 64>}, {pipeline_mode = #tpu.pipeline_mode<synchronous>, transform_indices = @transform_8, window_bounds = array<i64: 1, 64>}, {pipeline_mode = #tpu.pipeline_mode<synchronous>, transform_indices = @transform_9, window_bounds = array<i64: 64, 32>}, {pipeline_mode = #tpu.pipeline_mode<synchronous>, transform_indices = @transform_10, window_bounds = array<i64: 1, 32>}, {pipeline_mode = #tpu.pipeline_mode<synchronous>, transform_indices = @transform_11, window_bounds = array<i64: 1, 32>}, {pipeline_mode = #tpu.pipeline_mode<synchronous>, transform_indices = @transform_12, window_bounds = array<i64: 1, 32>}, {transform_indices = @transform_13, window_bounds = array<i64: 1, 64, 32>}]} {
    %c0 = arith.constant 0 : index
    %c0_0 = arith.constant 0 : index
    %c0_1 = arith.constant 0 : index
    %0 = vector.load %arg1[%c0, %c0_0, %c0_1] : memref<1x64x32xbf16, #tpu.memory_space<vmem>>, vector<1x64x32xbf16>
    %1 = vector.shape_cast %0 : vector<1x64x32xbf16> to vector<64x32xbf16>
    %2 = arith.extf %1 : vector<64x32xbf16> to vector<64x32xf32>
    %c0_2 = arith.constant 0 : index
    %c0_3 = arith.constant 0 : index
    %3 = vector.load %arg2[%c0_2, %c0_3] : memref<32x96xbf16, #tpu.memory_space<vmem>>, vector<32x96xbf16>
    %cst = arith.constant dense<0.000000e+00> : vector<64x96xf32>
    %4 = tpu.matmul %1, %3, %cst {dimension_numbers = #tpu.dot_dimension_numbers<[1], [0], [0], [1], [0, 0, 1, 1], [], []>} : vector<64x32xbf16>, vector<32x96xbf16>, vector<64x96xf32> -> vector<64x96xf32>
    %c0_4 = arith.constant 0 : index
    %c0_5 = arith.constant 0 : index
    %5 = vector.load %arg3[%c0_4, %c0_5] : memref<1x96xf32, #tpu.memory_space<vmem>>, vector<1x96xf32>
    %6 = vector.broadcast %5 : vector<1x96xf32> to vector<64x96xf32>
    %7 = arith.addf %4, %6 : vector<64x96xf32>
    %8 = vector.extract_strided_slice %7 {offsets = [0, 0], sizes = [64, 8], strides = [1, 1]} : vector<64x96xf32> to vector<64x8xf32>
    %cst_6 = arith.constant 0.353553385 : f32
    %9 = vector.broadcast %cst_6 : f32 to vector<64x8xf32>
    %10 = arith.mulf %8, %9 : vector<64x8xf32>
    %11 = vector.extract_strided_slice %7 {offsets = [0, 32], sizes = [64, 8], strides = [1, 1]} : vector<64x96xf32> to vector<64x8xf32>
    %12 = vector.extract_strided_slice %7 {offsets = [0, 64], sizes = [64, 8], strides = [1, 1]} : vector<64x96xf32> to vector<64x8xf32>
    %13 = arith.truncf %10 : vector<64x8xf32> to vector<64x8xbf16>
    %14 = arith.truncf %11 : vector<64x8xf32> to vector<64x8xbf16>
    %cst_7 = arith.constant dense<0.000000e+00> : vector<64x64xf32>
    %15 = tpu.matmul %13, %14, %cst_7 {dimension_numbers = #tpu.dot_dimension_numbers<[1], [1], [0], [0], [0, 0, 1, 0], [], []>} : vector<64x8xbf16>, vector<64x8xbf16>, vector<64x64xf32> -> vector<64x64xf32>
    %cst_8 = arith.constant dense<0xFF800000> : vector<64xf32>
    %16 = vector.multi_reduction <maximumf>, %15, %cst_8 [1] : vector<64x64xf32> to vector<64xf32>
    %17 = vector.shape_cast %16 : vector<64xf32> to vector<64x1xf32>
    %18 = vector.broadcast %17 : vector<64x1xf32> to vector<64x64xf32>
    %19 = arith.subf %15, %18 : vector<64x64xf32>
    %20 = math.exp %19 : vector<64x64xf32>
    %cst_9 = arith.constant dense<0.000000e+00> : vector<64xf32>
    %21 = vector.multi_reduction <add>, %20, %cst_9 [1] : vector<64x64xf32> to vector<64xf32>
    %22 = vector.shape_cast %21 : vector<64xf32> to vector<64x1xf32>
    %23 = tpu.reciprocal %22 {approx = true} : vector<64x1xf32> -> vector<64x1xf32>
    %24 = vector.broadcast %23 : vector<64x1xf32> to vector<64x64xf32>
    %25 = arith.mulf %20, %24 : vector<64x64xf32>
    %26 = arith.truncf %25 : vector<64x64xf32> to vector<64x64xbf16>
    %27 = arith.truncf %12 : vector<64x8xf32> to vector<64x8xbf16>
    %cst_10 = arith.constant dense<0.000000e+00> : vector<64x8xf32>
    %28 = tpu.matmul %26, %27, %cst_10 {dimension_numbers = #tpu.dot_dimension_numbers<[1], [0], [0], [1], [0, 0, 1, 1], [], []>} : vector<64x64xbf16>, vector<64x8xbf16>, vector<64x8xf32> -> vector<64x8xf32>
    %29 = arith.truncf %28 : vector<64x8xf32> to vector<64x8xbf16>
    %c0_11 = arith.constant 0 : index
    %c0_12 = arith.constant 0 : index
    %30 = vector.load %arg4[%c0_11, %c0_12] : memref<32x32xbf16, #tpu.memory_space<vmem>>, vector<8x32xbf16>
    %cst_13 = arith.constant dense<0.000000e+00> : vector<64x32xf32>
    %31 = tpu.matmul %29, %30, %cst_13 {dimension_numbers = #tpu.dot_dimension_numbers<[1], [0], [0], [1], [0, 0, 1, 1], [], []>} : vector<64x8xbf16>, vector<8x32xbf16>, vector<64x32xf32> -> vector<64x32xf32>
    %32 = vector.extract_strided_slice %7 {offsets = [0, 8], sizes = [64, 8], strides = [1, 1]} : vector<64x96xf32> to vector<64x8xf32>
    %cst_14 = arith.constant 0.353553385 : f32
    %33 = vector.broadcast %cst_14 : f32 to vector<64x8xf32>
    %34 = arith.mulf %32, %33 : vector<64x8xf32>
    %35 = vector.extract_strided_slice %7 {offsets = [0, 40], sizes = [64, 8], strides = [1, 1]} : vector<64x96xf32> to vector<64x8xf32>
    %36 = vector.extract_strided_slice %7 {offsets = [0, 72], sizes = [64, 8], strides = [1, 1]} : vector<64x96xf32> to vector<64x8xf32>
    %37 = arith.truncf %34 : vector<64x8xf32> to vector<64x8xbf16>
    %38 = arith.truncf %35 : vector<64x8xf32> to vector<64x8xbf16>
    %cst_15 = arith.constant dense<0.000000e+00> : vector<64x64xf32>
    %39 = tpu.matmul %37, %38, %cst_15 {dimension_numbers = #tpu.dot_dimension_numbers<[1], [1], [0], [0], [0, 0, 1, 0], [], []>} : vector<64x8xbf16>, vector<64x8xbf16>, vector<64x64xf32> -> vector<64x64xf32>
    %cst_16 = arith.constant dense<0xFF800000> : vector<64xf32>
    %40 = vector.multi_reduction <maximumf>, %39, %cst_16 [1] : vector<64x64xf32> to vector<64xf32>
    %41 = vector.shape_cast %40 : vector<64xf32> to vector<64x1xf32>
    %42 = vector.broadcast %41 : vector<64x1xf32> to vector<64x64xf32>
    %43 = arith.subf %39, %42 : vector<64x64xf32>
    %44 = math.exp %43 : vector<64x64xf32>
    %cst_17 = arith.constant dense<0.000000e+00> : vector<64xf32>
    %45 = vector.multi_reduction <add>, %44, %cst_17 [1] : vector<64x64xf32> to vector<64xf32>
    %46 = vector.shape_cast %45 : vector<64xf32> to vector<64x1xf32>
    %47 = tpu.reciprocal %46 {approx = true} : vector<64x1xf32> -> vector<64x1xf32>
    %48 = vector.broadcast %47 : vector<64x1xf32> to vector<64x64xf32>
    %49 = arith.mulf %44, %48 : vector<64x64xf32>
    %50 = arith.truncf %49 : vector<64x64xf32> to vector<64x64xbf16>
    %51 = arith.truncf %36 : vector<64x8xf32> to vector<64x8xbf16>
    %cst_18 = arith.constant dense<0.000000e+00> : vector<64x8xf32>
    %52 = tpu.matmul %50, %51, %cst_18 {dimension_numbers = #tpu.dot_dimension_numbers<[1], [0], [0], [1], [0, 0, 1, 1], [], []>} : vector<64x64xbf16>, vector<64x8xbf16>, vector<64x8xf32> -> vector<64x8xf32>
    %53 = arith.truncf %52 : vector<64x8xf32> to vector<64x8xbf16>
    %c8 = arith.constant 8 : index
    %c0_19 = arith.constant 0 : index
    %54 = vector.load %arg4[%c8, %c0_19] : memref<32x32xbf16, #tpu.memory_space<vmem>>, vector<8x32xbf16>
    %cst_20 = arith.constant dense<0.000000e+00> : vector<64x32xf32>
    %55 = tpu.matmul %53, %54, %cst_20 {dimension_numbers = #tpu.dot_dimension_numbers<[1], [0], [0], [1], [0, 0, 1, 1], [], []>} : vector<64x8xbf16>, vector<8x32xbf16>, vector<64x32xf32> -> vector<64x32xf32>
    %56 = arith.addf %31, %55 : vector<64x32xf32>
    %57 = vector.extract_strided_slice %7 {offsets = [0, 16], sizes = [64, 8], strides = [1, 1]} : vector<64x96xf32> to vector<64x8xf32>
    %cst_21 = arith.constant 0.353553385 : f32
    %58 = vector.broadcast %cst_21 : f32 to vector<64x8xf32>
    %59 = arith.mulf %57, %58 : vector<64x8xf32>
    %60 = vector.extract_strided_slice %7 {offsets = [0, 48], sizes = [64, 8], strides = [1, 1]} : vector<64x96xf32> to vector<64x8xf32>
    %61 = vector.extract_strided_slice %7 {offsets = [0, 80], sizes = [64, 8], strides = [1, 1]} : vector<64x96xf32> to vector<64x8xf32>
    %62 = arith.truncf %59 : vector<64x8xf32> to vector<64x8xbf16>
    %63 = arith.truncf %60 : vector<64x8xf32> to vector<64x8xbf16>
    %cst_22 = arith.constant dense<0.000000e+00> : vector<64x64xf32>
    %64 = tpu.matmul %62, %63, %cst_22 {dimension_numbers = #tpu.dot_dimension_numbers<[1], [1], [0], [0], [0, 0, 1, 0], [], []>} : vector<64x8xbf16>, vector<64x8xbf16>, vector<64x64xf32> -> vector<64x64xf32>
    %cst_23 = arith.constant dense<0xFF800000> : vector<64xf32>
    %65 = vector.multi_reduction <maximumf>, %64, %cst_23 [1] : vector<64x64xf32> to vector<64xf32>
    %66 = vector.shape_cast %65 : vector<64xf32> to vector<64x1xf32>
    %67 = vector.broadcast %66 : vector<64x1xf32> to vector<64x64xf32>
    %68 = arith.subf %64, %67 : vector<64x64xf32>
    %69 = math.exp %68 : vector<64x64xf32>
    %cst_24 = arith.constant dense<0.000000e+00> : vector<64xf32>
    %70 = vector.multi_reduction <add>, %69, %cst_24 [1] : vector<64x64xf32> to vector<64xf32>
    %71 = vector.shape_cast %70 : vector<64xf32> to vector<64x1xf32>
    %72 = tpu.reciprocal %71 {approx = true} : vector<64x1xf32> -> vector<64x1xf32>
    %73 = vector.broadcast %72 : vector<64x1xf32> to vector<64x64xf32>
    %74 = arith.mulf %69, %73 : vector<64x64xf32>
    %75 = arith.truncf %74 : vector<64x64xf32> to vector<64x64xbf16>
    %76 = arith.truncf %61 : vector<64x8xf32> to vector<64x8xbf16>
    %cst_25 = arith.constant dense<0.000000e+00> : vector<64x8xf32>
    %77 = tpu.matmul %75, %76, %cst_25 {dimension_numbers = #tpu.dot_dimension_numbers<[1], [0], [0], [1], [0, 0, 1, 1], [], []>} : vector<64x64xbf16>, vector<64x8xbf16>, vector<64x8xf32> -> vector<64x8xf32>
    %78 = arith.truncf %77 : vector<64x8xf32> to vector<64x8xbf16>
    %c16 = arith.constant 16 : index
    %c0_26 = arith.constant 0 : index
    %79 = vector.load %arg4[%c16, %c0_26] : memref<32x32xbf16, #tpu.memory_space<vmem>>, vector<8x32xbf16>
    %cst_27 = arith.constant dense<0.000000e+00> : vector<64x32xf32>
    %80 = tpu.matmul %78, %79, %cst_27 {dimension_numbers = #tpu.dot_dimension_numbers<[1], [0], [0], [1], [0, 0, 1, 1], [], []>} : vector<64x8xbf16>, vector<8x32xbf16>, vector<64x32xf32> -> vector<64x32xf32>
    %81 = arith.addf %56, %80 : vector<64x32xf32>
    %82 = vector.extract_strided_slice %7 {offsets = [0, 24], sizes = [64, 8], strides = [1, 1]} : vector<64x96xf32> to vector<64x8xf32>
    %cst_28 = arith.constant 0.353553385 : f32
    %83 = vector.broadcast %cst_28 : f32 to vector<64x8xf32>
    %84 = arith.mulf %82, %83 : vector<64x8xf32>
    %85 = vector.extract_strided_slice %7 {offsets = [0, 56], sizes = [64, 8], strides = [1, 1]} : vector<64x96xf32> to vector<64x8xf32>
    %86 = vector.extract_strided_slice %7 {offsets = [0, 88], sizes = [64, 8], strides = [1, 1]} : vector<64x96xf32> to vector<64x8xf32>
    %87 = arith.truncf %84 : vector<64x8xf32> to vector<64x8xbf16>
    %88 = arith.truncf %85 : vector<64x8xf32> to vector<64x8xbf16>
    %cst_29 = arith.constant dense<0.000000e+00> : vector<64x64xf32>
    %89 = tpu.matmul %87, %88, %cst_29 {dimension_numbers = #tpu.dot_dimension_numbers<[1], [1], [0], [0], [0, 0, 1, 0], [], []>} : vector<64x8xbf16>, vector<64x8xbf16>, vector<64x64xf32> -> vector<64x64xf32>
    %cst_30 = arith.constant dense<0xFF800000> : vector<64xf32>
    %90 = vector.multi_reduction <maximumf>, %89, %cst_30 [1] : vector<64x64xf32> to vector<64xf32>
    %91 = vector.shape_cast %90 : vector<64xf32> to vector<64x1xf32>
    %92 = vector.broadcast %91 : vector<64x1xf32> to vector<64x64xf32>
    %93 = arith.subf %89, %92 : vector<64x64xf32>
    %94 = math.exp %93 : vector<64x64xf32>
    %cst_31 = arith.constant dense<0.000000e+00> : vector<64xf32>
    %95 = vector.multi_reduction <add>, %94, %cst_31 [1] : vector<64x64xf32> to vector<64xf32>
    %96 = vector.shape_cast %95 : vector<64xf32> to vector<64x1xf32>
    %97 = tpu.reciprocal %96 {approx = true} : vector<64x1xf32> -> vector<64x1xf32>
    %98 = vector.broadcast %97 : vector<64x1xf32> to vector<64x64xf32>
    %99 = arith.mulf %94, %98 : vector<64x64xf32>
    %100 = arith.truncf %99 : vector<64x64xf32> to vector<64x64xbf16>
    %101 = arith.truncf %86 : vector<64x8xf32> to vector<64x8xbf16>
    %cst_32 = arith.constant dense<0.000000e+00> : vector<64x8xf32>
    %102 = tpu.matmul %100, %101, %cst_32 {dimension_numbers = #tpu.dot_dimension_numbers<[1], [0], [0], [1], [0, 0, 1, 1], [], []>} : vector<64x64xbf16>, vector<64x8xbf16>, vector<64x8xf32> -> vector<64x8xf32>
    %103 = arith.truncf %102 : vector<64x8xf32> to vector<64x8xbf16>
    %c24 = arith.constant 24 : index
    %c0_33 = arith.constant 0 : index
    %104 = vector.load %arg4[%c24, %c0_33] : memref<32x32xbf16, #tpu.memory_space<vmem>>, vector<8x32xbf16>
    %cst_34 = arith.constant dense<0.000000e+00> : vector<64x32xf32>
    %105 = tpu.matmul %103, %104, %cst_34 {dimension_numbers = #tpu.dot_dimension_numbers<[1], [0], [0], [1], [0, 0, 1, 1], [], []>} : vector<64x8xbf16>, vector<8x32xbf16>, vector<64x32xf32> -> vector<64x32xf32>
    %106 = arith.addf %81, %105 : vector<64x32xf32>
    %c0_35 = arith.constant 0 : index
    %c0_36 = arith.constant 0 : index
    %107 = vector.load %arg5[%c0_35, %c0_36] : memref<1x32xf32, #tpu.memory_space<vmem>>, vector<1x32xf32>
    %108 = vector.broadcast %107 : vector<1x32xf32> to vector<64x32xf32>
    %109 = arith.addf %106, %108 : vector<64x32xf32>
    %110 = arith.addf %2, %109 : vector<64x32xf32>
    %c0_37 = arith.constant 0 : index
    %c0_38 = arith.constant 0 : index
    %111 = vector.load %arg6[%c0_37, %c0_38] : memref<1x32xf32, #tpu.memory_space<vmem>>, vector<1x32xf32>
    %c0_39 = arith.constant 0 : index
    %c0_40 = arith.constant 0 : index
    %112 = vector.load %arg7[%c0_39, %c0_40] : memref<1x32xf32, #tpu.memory_space<vmem>>, vector<1x32xf32>
    %cst_41 = arith.constant dense<0.000000e+00> : vector<64xf32>
    %113 = vector.multi_reduction <add>, %110, %cst_41 [1] : vector<64x32xf32> to vector<64xf32>
    %114 = vector.shape_cast %113 : vector<64xf32> to vector<64x1xf32>
    %cst_42 = arith.constant 3.200000e+01 : f32
    %115 = vector.broadcast %cst_42 : f32 to vector<64x1xf32>
    %116 = arith.divf %114, %115 : vector<64x1xf32>
    %117 = vector.broadcast %116 : vector<64x1xf32> to vector<64x32xf32>
    %118 = arith.subf %110, %117 : vector<64x32xf32>
    %119 = arith.mulf %118, %118 : vector<64x32xf32>
    %cst_43 = arith.constant dense<0.000000e+00> : vector<64xf32>
    %120 = vector.multi_reduction <add>, %119, %cst_43 [1] : vector<64x32xf32> to vector<64xf32>
    %121 = vector.shape_cast %120 : vector<64xf32> to vector<64x1xf32>
    %cst_44 = arith.constant 3.200000e+01 : f32
    %122 = vector.broadcast %cst_44 : f32 to vector<64x1xf32>
    %123 = arith.divf %121, %122 : vector<64x1xf32>
    %cst_45 = arith.constant 9.99999974E-6 : f32
    %124 = vector.broadcast %cst_45 : f32 to vector<64x1xf32>
    %125 = arith.addf %123, %124 : vector<64x1xf32>
    %126 = math.rsqrt %125 : vector<64x1xf32>
    %127 = vector.broadcast %126 : vector<64x1xf32> to vector<64x32xf32>
    %128 = arith.mulf %118, %127 : vector<64x32xf32>
    %129 = vector.broadcast %111 : vector<1x32xf32> to vector<64x32xf32>
    %130 = arith.mulf %128, %129 : vector<64x32xf32>
    %131 = vector.broadcast %112 : vector<1x32xf32> to vector<64x32xf32>
    %132 = arith.addf %130, %131 : vector<64x32xf32>
    %133 = arith.truncf %132 : vector<64x32xf32> to vector<64x32xbf16>
    %c0_46 = arith.constant 0 : index
    %c0_47 = arith.constant 0 : index
    %134 = vector.load %arg8[%c0_46, %c0_47] : memref<32x64xbf16, #tpu.memory_space<vmem>>, vector<32x64xbf16>
    %cst_48 = arith.constant dense<0.000000e+00> : vector<64x64xf32>
    %135 = tpu.matmul %133, %134, %cst_48 {dimension_numbers = #tpu.dot_dimension_numbers<[1], [0], [0], [1], [0, 0, 1, 1], [], []>} : vector<64x32xbf16>, vector<32x64xbf16>, vector<64x64xf32> -> vector<64x64xf32>
    %c0_49 = arith.constant 0 : index
    %c0_50 = arith.constant 0 : index
    %136 = vector.load %arg9[%c0_49, %c0_50] : memref<1x64xf32, #tpu.memory_space<vmem>>, vector<1x64xf32>
    %137 = vector.broadcast %136 : vector<1x64xf32> to vector<64x64xf32>
    %138 = arith.addf %135, %137 : vector<64x64xf32>
    %cst_51 = arith.constant 0.000000e+00 : f32
    %139 = vector.broadcast %cst_51 : f32 to vector<64x64xf32>
    %140 = arith.maximumf %138, %139 : vector<64x64xf32>
    %141 = arith.truncf %140 : vector<64x64xf32> to vector<64x64xbf16>
    %c0_52 = arith.constant 0 : index
    %c0_53 = arith.constant 0 : index
    %142 = vector.load %arg10[%c0_52, %c0_53] : memref<64x32xbf16, #tpu.memory_space<vmem>>, vector<64x32xbf16>
    %cst_54 = arith.constant dense<0.000000e+00> : vector<64x32xf32>
    %143 = tpu.matmul %141, %142, %cst_54 {dimension_numbers = #tpu.dot_dimension_numbers<[1], [0], [0], [1], [0, 0, 1, 1], [], []>} : vector<64x64xbf16>, vector<64x32xbf16>, vector<64x32xf32> -> vector<64x32xf32>
    %c0_55 = arith.constant 0 : index
    %c0_56 = arith.constant 0 : index
    %144 = vector.load %arg11[%c0_55, %c0_56] : memref<1x32xf32, #tpu.memory_space<vmem>>, vector<1x32xf32>
    %145 = vector.broadcast %144 : vector<1x32xf32> to vector<64x32xf32>
    %146 = arith.addf %143, %145 : vector<64x32xf32>
    %147 = arith.addf %132, %146 : vector<64x32xf32>
    %c0_57 = arith.constant 0 : index
    %c0_58 = arith.constant 0 : index
    %148 = vector.load %arg12[%c0_57, %c0_58] : memref<1x32xf32, #tpu.memory_space<vmem>>, vector<1x32xf32>
    %c0_59 = arith.constant 0 : index
    %c0_60 = arith.constant 0 : index
    %149 = vector.load %arg13[%c0_59, %c0_60] : memref<1x32xf32, #tpu.memory_space<vmem>>, vector<1x32xf32>
    %cst_61 = arith.constant dense<0.000000e+00> : vector<64xf32>
    %150 = vector.multi_reduction <add>, %147, %cst_61 [1] : vector<64x32xf32> to vector<64xf32>
    %151 = vector.shape_cast %150 : vector<64xf32> to vector<64x1xf32>
    %cst_62 = arith.constant 3.200000e+01 : f32
    %152 = vector.broadcast %cst_62 : f32 to vector<64x1xf32>
    %153 = arith.divf %151, %152 : vector<64x1xf32>
    %154 = vector.broadcast %153 : vector<64x1xf32> to vector<64x32xf32>
    %155 = arith.subf %147, %154 : vector<64x32xf32>
    %156 = arith.mulf %155, %155 : vector<64x32xf32>
    %cst_63 = arith.constant dense<0.000000e+00> : vector<64xf32>
    %157 = vector.multi_reduction <add>, %156, %cst_63 [1] : vector<64x32xf32> to vector<64xf32>
    %158 = vector.shape_cast %157 : vector<64xf32> to vector<64x1xf32>
    %cst_64 = arith.constant 3.200000e+01 : f32
    %159 = vector.broadcast %cst_64 : f32 to vector<64x1xf32>
    %160 = arith.divf %158, %159 : vector<64x1xf32>
    %cst_65 = arith.constant 9.99999974E-6 : f32
    %161 = vector.broadcast %cst_65 : f32 to vector<64x1xf32>
    %162 = arith.addf %160, %161 : vector<64x1xf32>
    %163 = math.rsqrt %162 : vector<64x1xf32>
    %164 = vector.broadcast %163 : vector<64x1xf32> to vector<64x32xf32>
    %165 = arith.mulf %155, %164 : vector<64x32xf32>
    %166 = vector.broadcast %148 : vector<1x32xf32> to vector<64x32xf32>
    %167 = arith.mulf %165, %166 : vector<64x32xf32>
    %168 = vector.broadcast %149 : vector<1x32xf32> to vector<64x32xf32>
    %169 = arith.addf %167, %168 : vector<64x32xf32>
    %170 = arith.truncf %169 : vector<64x32xf32> to vector<64x32xbf16>
    %c0_66 = arith.constant 0 : index
    %c0_67 = arith.constant 0 : index
    %c0_68 = arith.constant 0 : index
    %171 = vector.load %arg14[%c0_66, %c0_67, %c0_68] : memref<1x64x32xbf16, #tpu.memory_space<vmem>>, vector<1x64x32xbf16>
    %172 = vector.shape_cast %171 : vector<1x64x32xbf16> to vector<64x32xbf16>
    %173 = vector.shape_cast %170 : vector<64x32xbf16> to vector<1x64x32xbf16>
    tpu.vector_store %arg14[%c0_66, %c0_67, %c0_68], %173 {strides = array<i32>} : memref<1x64x32xbf16, #tpu.memory_space<vmem>>, vector<1x64x32xbf16>,
    return
  }
  func.func @transform_0(%arg0: i32) -> (i32, i32, i32) {
    %c0_i32 = arith.constant 0 : i32
    %c0_i32_0 = arith.constant 0 : i32
    %c0_i32_1 = arith.constant 0 : i32
    return %arg0, %c0_i32, %c0_i32_0 : i32, i32, i32
  }
  func.func @transform_1(%arg0: i32) -> (i32, i32) {
    %c0_i32 = arith.constant 0 : i32
    %c0_i32_0 = arith.constant 0 : i32
    %c0_i32_1 = arith.constant 0 : i32
    return %c0_i32, %c0_i32_0 : i32, i32
  }
  func.func @transform_2(%arg0: i32) -> (i32, i32) {
    %c0_i32 = arith.constant 0 : i32
    %c0_i32_0 = arith.constant 0 : i32
    %c0_i32_1 = arith.constant 0 : i32
    return %c0_i32, %c0_i32_0 : i32, i32
  }
  func.func @transform_3(%arg0: i32) -> (i32, i32) {
    %c0_i32 = arith.constant 0 : i32
    %c0_i32_0 = arith.constant 0 : i32
    %c0_i32_1 = arith.constant 0 : i32
    return %c0_i32, %c0_i32_0 : i32, i32
  }
  func.func @transform_4(%arg0: i32) -> (i32, i32) {
    %c0_i32 = arith.constant 0 : i32
    %c0_i32_0 = arith.constant 0 : i32
    %c0_i32_1 = arith.constant 0 : i32
    return %c0_i32, %c0_i32_0 : i32, i32
  }
  func.func @transform_5(%arg0: i32) -> (i32, i32) {
    %c0_i32 = arith.constant 0 : i32
    %c0_i32_0 = arith.constant 0 : i32
    %c0_i32_1 = arith.constant 0 : i32
    return %c0_i32, %c0_i32_0 : i32, i32
  }
  func.func @transform_6(%arg0: i32) -> (i32, i32) {
    %c0_i32 = arith.constant 0 : i32
    %c0_i32_0 = arith.constant 0 : i32
    %c0_i32_1 = arith.constant 0 : i32
    return %c0_i32, %c0_i32_0 : i32, i32
  }
  func.func @transform_7(%arg0: i32) -> (i32, i32) {
    %c0_i32 = arith.constant 0 : i32
    %c0_i32_0 = arith.constant 0 : i32
    %c0_i32_1 = arith.constant 0 : i32
    return %c0_i32, %c0_i32_0 : i32, i32
  }
  func.func @transform_8(%arg0: i32) -> (i32, i32) {
    %c0_i32 = arith.constant 0 : i32
    %c0_i32_0 = arith.constant 0 : i32
    %c0_i32_1 = arith.constant 0 : i32
    return %c0_i32, %c0_i32_0 : i32, i32
  }
  func.func @transform_9(%arg0: i32) -> (i32, i32) {
    %c0_i32 = arith.constant 0 : i32
    %c0_i32_0 = arith.constant 0 : i32
    %c0_i32_1 = arith.constant 0 : i32
    return %c0_i32, %c0_i32_0 : i32, i32
  }
  func.func @transform_10(%arg0: i32) -> (i32, i32) {
    %c0_i32 = arith.constant 0 : i32
    %c0_i32_0 = arith.constant 0 : i32
    %c0_i32_1 = arith.constant 0 : i32
    return %c0_i32, %c0_i32_0 : i32, i32
  }
  func.func @transform_11(%arg0: i32) -> (i32, i32) {
    %c0_i32 = arith.constant 0 : i32
    %c0_i32_0 = arith.constant 0 : i32
    %c0_i32_1 = arith.constant 0 : i32
    return %c0_i32, %c0_i32_0 : i32, i32
  }
  func.func @transform_12(%arg0: i32) -> (i32, i32) {
    %c0_i32 = arith.constant 0 : i32
    %c0_i32_0 = arith.constant 0 : i32
    %c0_i32_1 = arith.constant 0 : i32
    return %c0_i32, %c0_i32_0 : i32, i32
  }
  func.func @transform_13(%arg0: i32) -> (i32, i32, i32) {
    %c0_i32 = arith.constant 0 : i32
    %c0_i32_0 = arith.constant 0 : i32
    %c0_i32_1 = arith.constant 0 : i32
    return %arg0, %c0_i32, %c0_i32_0 : i32, i32, i32
  }
}

module attributes {stable_mosaic.version = 11 : i64} {
  func.func @_head_kernel(%arg0: i32, %arg1: memref<1x64x32xbf16, #tpu.memory_space<vmem>>, %arg2: memref<32x16xbf16, #tpu.memory_space<vmem>>, %arg3: memref<1x16xf32, #tpu.memory_space<vmem>>, %arg4: memref<1x64x16xf32, #tpu.memory_space<vmem>>) attributes {dimension_semantics = [#tpu.dimension_semantics<parallel>], iteration_bounds = array<i64: 2>, scalar_prefetch = 0 : i64, scratch_operands = 0 : i64, tpu.core_type = #tpu.core_type<tc>, window_params = [{transform_indices = @transform_0, window_bounds = array<i64: 1, 64, 32>}, {pipeline_mode = #tpu.pipeline_mode<synchronous>, transform_indices = @transform_1, window_bounds = array<i64: 32, 16>}, {pipeline_mode = #tpu.pipeline_mode<synchronous>, transform_indices = @transform_2, window_bounds = array<i64: 1, 16>}, {transform_indices = @transform_3, window_bounds = array<i64: 1, 64, 16>}]} {
    %c0 = arith.constant 0 : index
    %c0_0 = arith.constant 0 : index
    %c0_1 = arith.constant 0 : index
    %0 = vector.load %arg1[%c0, %c0_0, %c0_1] : memref<1x64x32xbf16, #tpu.memory_space<vmem>>, vector<1x64x32xbf16>
    %1 = vector.shape_cast %0 : vector<1x64x32xbf16> to vector<64x32xbf16>
    %c0_2 = arith.constant 0 : index
    %c0_3 = arith.constant 0 : index
    %2 = vector.load %arg2[%c0_2, %c0_3] : memref<32x16xbf16, #tpu.memory_space<vmem>>, vector<32x16xbf16>
    %cst = arith.constant dense<0.000000e+00> : vector<64x16xf32>
    %3 = tpu.matmul %1, %2, %cst {dimension_numbers = #tpu.dot_dimension_numbers<[1], [0], [0], [1], [0, 0, 1, 1], [], []>} : vector<64x32xbf16>, vector<32x16xbf16>, vector<64x16xf32> -> vector<64x16xf32>
    %c0_4 = arith.constant 0 : index
    %c0_5 = arith.constant 0 : index
    %4 = vector.load %arg3[%c0_4, %c0_5] : memref<1x16xf32, #tpu.memory_space<vmem>>, vector<1x16xf32>
    %5 = vector.broadcast %4 : vector<1x16xf32> to vector<64x16xf32>
    %6 = arith.addf %3, %5 : vector<64x16xf32>
    %c0_6 = arith.constant 0 : index
    %c0_7 = arith.constant 0 : index
    %c0_8 = arith.constant 0 : index
    %7 = vector.load %arg4[%c0_6, %c0_7, %c0_8] : memref<1x64x16xf32, #tpu.memory_space<vmem>>, vector<1x64x16xf32>
    %8 = vector.shape_cast %7 : vector<1x64x16xf32> to vector<64x16xf32>
    %9 = vector.shape_cast %6 : vector<64x16xf32> to vector<1x64x16xf32>
    tpu.vector_store %arg4[%c0_6, %c0_7, %c0_8], %9 {strides = array<i32>} : memref<1x64x16xf32, #tpu.memory_space<vmem>>, vector<1x64x16xf32>,
    return
  }
  func.func @transform_0(%arg0: i32) -> (i32, i32, i32) {
    %c0_i32 = arith.constant 0 : i32
    %c0_i32_0 = arith.constant 0 : i32
    %c0_i32_1 = arith.constant 0 : i32
    return %arg0, %c0_i32, %c0_i32_0 : i32, i32, i32
  }
  func.func @transform_1(%arg0: i32) -> (i32, i32) {
    %c0_i32 = arith.constant 0 : i32
    %c0_i32_0 = arith.constant 0 : i32
    %c0_i32_1 = arith.constant 0 : i32
    return %c0_i32, %c0_i32_0 : i32, i32
  }
  func.func @transform_2(%arg0: i32) -> (i32, i32) {
    %c0_i32 = arith.constant 0 : i32
    %c0_i32_0 = arith.constant 0 : i32
    %c0_i32_1 = arith.constant 0 : i32
    return %c0_i32, %c0_i32_0 : i32, i32
  }
  func.func @transform_3(%arg0: i32) -> (i32, i32, i32) {
    %c0_i32 = arith.constant 0 : i32
    %c0_i32_0 = arith.constant 0 : i32
    %c0_i32_1 = arith.constant 0 : i32
    return %arg0, %c0_i32, %c0_i32_0 : i32, i32, i32
  }
}

</mosaic_0001>

<bundles_post_ra>
// kernel: vision_transformer_forward.4
= control target key start
LH: loop header
LB: loop body
LE: loop exit
PB: predicated region body
PF: predicated region fallthrough
CT: control target
= control target key end

     0   :  { %s565_s15 = smov 0   ;;  %s642_s0 = inlined_call_operand.vmem [shape: f32[2,64,3], index: 0, kind: input, shape index: {}]   ;;  %s643_s1 = inlined_call_operand.vmem [shape: f32[3,32], index: 1, kind: input, shape index: {}]   ;;  %s644_s2 = inlined_call_operand.vmem [shape: f32[1,32], index: 2, kind: input, shape index: {}]   ;;  %s645_s3 = inlined_call_operand.vmem [shape: f32[64,32], index: 3, kind: input, shape index: {}]   ;;  %s646_s4 = inlined_call_operand.vmem [shape: bf16[2,64,32], index: 4, kind: output, shape index: {}]  }
   0x1 LB: > { %s460_s16 = sadd.s32 4294967295, %s538_s15   ;;  %p464_p0 = scmp.ge.s32.totalorder %s538_s15, 1  ;;  %s538_s15 = sphi %s565_s15, %s14_s15  }
   0x2   : > { %p162_p1 = scmp.lt.s32.totalorder %s538_s15, 3 }
   0x4   : > { %p163_p2 = pnand %p464_p0, %p162_p1 }
   0x5   : > { %v206_v0 = vld [vmem:[%s643_s1] sm:$0x7] (!%p163_p2)  ;;  %vm239_vm0 = vcmask (!%p163_p2), 1042432   ;;  %p188_p3 = scmp.lt.s32.totalorder (!%p163_p2), %s460_s16, 1  ;;  %vm214_vm1 = vcmask (!%p163_p2), 23552   ;;  %v349_v11 = vld [vmem:[%s645_s3 + $0x8] sm:$0xff] (!%p163_p2) }
   0x6   : > { %166 = sbr.rel (%p163_p2) target bundleno = 243 (0xf3), region = 36  ;;  %508 = vmatprep.subr.msk.mxu0 (!%p163_p2), %vm239_vm0, %v206_v0  ;;  %522 = vmatprep.subr.msk.mxu1 (!%p163_p2), %vm239_vm0, %v206_v0  ;;  %v469_v9 = vld [vmem:[%s644_s2] ss:$0 sm:$0xff] (!%p163_p2)  ;;  %v353_v13 = vld [vmem:[%s645_s3 + $0x28] sm:$0xff] (!%p163_p2)  ;;  %vm396_vm2 = vcmask (!%p163_p2), 257024   ;;  %v351_v27 = vld [vmem:[%s645_s3 + $0x18] sm:$0xff] (!%p163_p2) }
   0x7   : > { %509 = vmatpush3.msk.msra.mxu0 (!%p163_p2), %vm239_vm0, %v206_v0  ;;  %523 = vmatpush3.msk.msra.mxu1 (!%p163_p2), %vm239_vm0, %v206_v0  ;;  %v348_v17 = vld [vmem:[%s645_s3] sm:$0xff] (!%p163_p2)  ;;  %v355_v29 = vld [vmem:[%s645_s3 + $0x38] sm:$0xff] (!%p163_p2)  ;;  %v350_v35 = vld [vmem:[%s645_s3 + $0x10] sm:$0xff] (!%p163_p2) }
   0x8   : > { %v352_v19 = vld [vmem:[%s645_s3 + $0x20] sm:$0xff] (!%p163_p2)  ;;  %v354_v37 = vld [vmem:[%s645_s3 + $0x30] sm:$0xff] (!%p163_p2) }
   0xd   : > { %s648_s16 = smov (!%p188_p3, %s460_s16), 1 }
   0xe   : > { %s489_s19 = sshll.u32 %s648_s16, 6  ;;  %s490_s29 = sshll.u32 %s648_s16, 5 }
   0xf   : > { %s192_s22 = scalar_lea.vmem %s642_s0, %s489_s19  ;;  %s609_s10 = scalar_lea.vmem %s646_s4, %s490_s29 }
  0x10   : > { %v198_v1 = vld [vmem:[%s192_s22] sm:$0xff]  ;;  %v199_v3 = vld [vmem:[%s192_s22 + $0x8] sm:$0xff]  ;;  %v200_v5 = vld [vmem:[%s192_s22 + $0x10] sm:$0xff] }
  0x11   : > { %v202_v2 = vld [vmem:[%s192_s22 + $0x20] sm:$0xff]  ;;  %510 = vmatprep.mubr.msk.f32.mxu0 %vm214_vm1, %v198_v1  ;;  %v203_v4 = vld [vmem:[%s192_s22 + $0x28] sm:$0xff]  ;;  %v204_v6 = vld [vmem:[%s192_s22 + $0x30] sm:$0xff] }
  0x12   : > { %516 = vmatprep.mubr.msk.f32.mxu1 %vm214_vm1, %v202_v2  ;;  %511 = vmatmul.mubr.msk.f32.vlgmr.msra.gmra.mrb[0].mxu0 %vm214_vm1, %v199_v3  ;;  %v201_v7 = vld [vmem:[%s192_s22 + $0x18] sm:$0xff] }
  0x13   : > { %517 = vmatmul.mubr.msk.f32.vlgmr.msra.gmra.mrb[0].mxu1 %vm214_vm1, %v203_v4  ;;  %513 = vmatprep.mubr.msk.f32.mxu0 %vm214_vm1, %v200_v5  ;;  %v205_v8 = vld [vmem:[%s192_s22 + $0x38] sm:$0xff] }
  0x14   : > { %519 = vmatprep.mubr.msk.f32.mxu1 %vm214_vm1, %v204_v6 }
  0x16   : > { %514 = vmatmul.mubr.msk.f32.gmra.mrb[2].mxu0 %vm214_vm1, %v201_v7 }
  0x17   : > { %520 = vmatmul.mubr.msk.f32.gmra.mrb[2].mxu1 %vm214_vm1, %v205_v8 }
  0xe5   : > { %v512_v10 = vpop.f32.mrb[0].mxu0 }
  0xe6   : > { %v518_v12 = vpop.f32.mrb[0].mxu1  ;;  %v315_v14 = vadd.f32 %v512_v10, %v469_v9  ;;  %v309_v16 = vpop.f32.mrb[1].mxu0 }
  0xe7   : > { %v335_v15 = vadd.f32 %v518_v12, %v469_v9  ;;  %v329_v18 = vpop.f32.mrb[1].mxu1  ;;  %v310_v20 = vadd.f32 %v469_v9, %v309_v16 }
  0xe8   : > { %v330_v21 = vadd.f32 %v469_v9, %v329_v18  ;;  %v357_v22 = vadd.f32 %v349_v11, %v315_v14 }
  0xe9   : > { %v361_v23 = vadd.f32 %v353_v13, %v335_v15  ;;  %v356_v24 = vadd.f32 %v348_v17, %v310_v20  ;;  %v515_v26 = vpop.f32.mrb[2].mxu0 }
  0xea   : > { %v360_v25 = vadd.f32 %v352_v19, %v330_v21  ;;  %v521_v28 = vpop.f32.mrb[2].mxu1  ;;  %v492_v30 = vpack.c.bf16 %v357_v22, %v357_v22  ;;  %v325_v32 = vadd.f32 %v515_v26, %v469_v9  ;;  %v319_v34 = vpop.f32.mrb[3].mxu0 }
  0xeb   : > { %v496_v31 = vpack.c.bf16 %v361_v23, %v361_v23  ;;  %v345_v33 = vadd.f32 %v521_v28, %v469_v9  ;;  %v339_v36 = vpop.f32.mrb[3].mxu1  ;;  %v491_v38 = vpack.c.bf16 %v356_v24, %v356_v24  ;;  %v320_v40 = vadd.f32 %v469_v9, %v319_v34 }
  0xec   : > { %v495_v39 = vpack.c.bf16 %v360_v25, %v360_v25  ;;  %v340_v41 = vadd.f32 %v469_v9, %v339_v36  ;;  %398 = vst.msk [vmem:[%s609_s10 + $0x4] sm:$0xf] %vm396_vm2, %v492_v30  ;;  %v359_v42 = vadd.f32 %v351_v27, %v325_v32 }
  0xed   : > { %402 = vst.msk [vmem:[%s609_s10 + $0x14] sm:$0xf] %vm396_vm2, %v496_v31  ;;  %v363_v43 = vadd.f32 %v355_v29, %v345_v33  ;;  %397 = vst.msk [vmem:[%s609_s10] sm:$0xf] %vm396_vm2, %v491_v38  ;;  %v358_v44 = vadd.f32 %v350_v35, %v320_v40 }
  0xee   : > { %401 = vst.msk [vmem:[%s609_s10 + $0x10] sm:$0xf] %vm396_vm2, %v495_v39  ;;  %v362_v45 = vadd.f32 %v354_v37, %v340_v41  ;;  %v494_v46 = vpack.c.bf16 %v359_v42, %v359_v42 }
  0xef   : > { %v498_v47 = vpack.c.bf16 %v363_v43, %v363_v43  ;;  %v493_v48 = vpack.c.bf16 %v358_v44, %v358_v44 }
  0xf0   : > { %v497_v49 = vpack.c.bf16 %v362_v45, %v362_v45  ;;  %400 = vst.msk [vmem:[%s609_s10 + $0xc] sm:$0xf] %vm396_vm2, %v494_v46 }
  0xf1   : > { %404 = vst.msk [vmem:[%s609_s10 + $0x1c] sm:$0xf] %vm396_vm2, %v498_v47  ;;  %399 = vst.msk [vmem:[%s609_s10 + $0x8] sm:$0xf] %vm396_vm2, %v493_v48 }
  0xf2   : > { %403 = vst.msk [vmem:[%s609_s10 + $0x18] sm:$0xf] %vm396_vm2, %v497_v49 }
  0xf3 PF: > { %s14_s15 = sadd.s32 1, %s538_s15  }
  0xf4   : > { %p11_p4 = scmp.ge.s32.totalorder %s14_s15, 4  }
  0xf6   :  { %13 = sbr.rel (!%p11_p4) target bundleno = 1 (0x1), region = 66 }

// kernel: vision_transformer_forward.7
= control target key start
LH: loop header
LB: loop body
LE: loop exit
PB: predicated region body
PF: predicated region fallthrough
CT: control target
= control target key end

     0   :  { %s453_s12 = smov 0   ;;  %s487_s0 = inlined_call_operand.vmem [shape: bf16[2,64,32], index: 0, kind: input, shape index: {}]   ;;  %s488_s1 = inlined_call_operand.vmem [shape: bf16[32,16], index: 1, kind: input, shape index: {}]   ;;  %s489_s2 = inlined_call_operand.vmem [shape: f32[1,16], index: 2, kind: input, shape index: {}]   ;;  %s490_s3 = inlined_call_operand.vmem [shape: f32[2,64,16], index: 3, kind: output, shape index: {}]  }
   0x1 LB: > { %s365_s13 = sadd.s32 4294967295, %s431_s12   ;;  %p369_p0 = scmp.ge.s32.totalorder %s431_s12, 1  ;;  %s431_s12 = sphi %s453_s12, %s13_s12  }
   0x2   : > { %p137_p1 = scmp.lt.s32.totalorder %s431_s12, 3 }
   0x4   : > { %p138_p2 = pnand %p369_p0, %p137_p1 }
   0x5   : > { %v419_v0 = vld [vmem:[%s488_s1] sm:$0xff] (!%p138_p2)   ;;  %p161_p3 = scmp.lt.s32.totalorder (!%p138_p2), %s365_s13, 1  ;;  %v420_v1 = vld [vmem:[%s488_s1 + $0x8] sm:$0xff] (!%p138_p2)   ;;  %vm223_vm0 = vcmask (!%p138_p2), 261120   ;;  %vm301_vm1 = vcmask (!%p138_p2), 130048  }
   0x6   : > { %141 = sbr.rel (%p138_p2) target bundleno = 236 (0xec), region = 32  ;;  %395 = vmatprep.subr.bf16.mxu0 (!%p138_p2), %v419_v0  ;;  %407 = vmatprep.subr.bf16.mxu1 (!%p138_p2), %v419_v0  ;;  %v374_v6 = vld [vmem:[%s489_s2] ss:$0 sm:$0xff] (!%p138_p2) }
   0x7   : > { %396 = vmatpush3.bf16.msra.mxu0 (!%p138_p2), %v419_v0  ;;  %409 = vmatpush3.bf16.msra.mxu1 (!%p138_p2), %v419_v0 }
   0x8   : > { %397 = vmatprep.subr.bf16.mxu0 (!%p138_p2), %v420_v1  ;;  %408 = vmatprep.subr.bf16.mxu1 (!%p138_p2), %v420_v1 }
   0xb   : > { %398 = vmatpush3.bf16.msra.mxu0 (!%p138_p2), %v420_v1  ;;  %410 = vmatpush3.bf16.msra.mxu1 (!%p138_p2), %v420_v1 }
   0xd   : > { %s492_s13 = smov (!%p161_p3, %s365_s13), 1 }
   0xe   : > { %s387_s18 = sshll.u32 %s492_s13, 5  ;;  %s388_s22 = sshll.u32 %s492_s13, 6 }
   0xf   : > { %s165_s21 = scalar_lea.vmem %s487_s0, %s387_s18  ;;  %s170_s27 = scalar_lea.vmem %s490_s3, %s388_s22 }
  0x10   : > { %v421_v2 = vld [vmem:[%s165_s21] sm:$0xff]   ;;  %v422_v3 = vld [vmem:[%s165_s21 + $0x10] sm:$0xff]   ;;  %v423_v4 = vld [vmem:[%s165_s21 + $0x8] sm:$0xff]  }
  0x11   : > { %399 = vmatprep.mubr.msk.bf16.mxu0 %vm223_vm0, %v421_v2  ;;  %403 = vmatprep.mubr.msk.bf16.mxu1 %vm223_vm0, %v422_v3  ;;  %v424_v5 = vld [vmem:[%s165_s21 + $0x18] sm:$0xff]  }
  0x12   : > { %400 = vmatmul.mubr.msk.bf16.vlgmr.msra.gmra.mrb[0].mxu0 %vm223_vm0, %v423_v4  ;;  %404 = vmatmul.mubr.msk.bf16.vlgmr.msra.gmra.mrb[0].mxu1 %vm223_vm0, %v424_v5 }
  0xe5   : > { %v401_v7 = vpop.f32.mrb[0].mxu0  ;;  %v405_v9 = vpop.f32.mrb[0].mxu1 }
  0xe6   : > { %v279_v8 = vadd.f32 %v401_v7, %v374_v6  ;;  %v270_v10 = vpop.f32.mrb[1].mxu0  ;;  %v295_v11 = vadd.f32 %v405_v9, %v374_v6  ;;  %v286_v13 = vpop.f32.mrb[1].mxu1 }
  0xe7   : > { %v271_v12 = vadd.f32 %v374_v6, %v270_v10  ;;  %v402_v14 = vpop.f32.mrb[2].mxu0  ;;  %v287_v15 = vadd.f32 %v374_v6, %v286_v13  ;;  %v406_v17 = vpop.f32.mrb[2].mxu1 }
  0xe8   : > { %304 = vst.msk [vmem:[%s170_s27 + $0x10] sm:$0xff] %vm301_vm1, %v279_v8  ;;  %v282_v16 = vadd.f32 %v402_v14, %v374_v6  ;;  %v273_v18 = vpop.f32.mrb[3].mxu0  ;;  %308 = vst.msk [vmem:[%s170_s27 + $0x30] sm:$0xff] %vm301_vm1, %v295_v11  ;;  %v298_v19 = vadd.f32 %v406_v17, %v374_v6  ;;  %v289_v21 = vpop.f32.mrb[3].mxu1 }
  0xe9   : > { %302 = vst.msk [vmem:[%s170_s27] sm:$0xff] %vm301_vm1, %v271_v12  ;;  %v274_v20 = vadd.f32 %v374_v6, %v273_v18  ;;  %306 = vst.msk [vmem:[%s170_s27 + $0x20] sm:$0xff] %vm301_vm1, %v287_v15  ;;  %v290_v22 = vadd.f32 %v374_v6, %v289_v21 }
  0xea   : > { %305 = vst.msk [vmem:[%s170_s27 + $0x18] sm:$0xff] %vm301_vm1, %v282_v16  ;;  %309 = vst.msk [vmem:[%s170_s27 + $0x38] sm:$0xff] %vm301_vm1, %v298_v19 }
  0xeb   : > { %303 = vst.msk [vmem:[%s170_s27 + $0x8] sm:$0xff] %vm301_vm1, %v274_v20  ;;  %307 = vst.msk [vmem:[%s170_s27 + $0x28] sm:$0xff] %vm301_vm1, %v290_v22 }
  0xec PF: > { %s13_s12 = sadd.s32 1, %s431_s12  }
  0xed   : > { %p10_p4 = scmp.ge.s32.totalorder %s13_s12, 4  }
  0xef   :  { %12 = sbr.rel (!%p10_p4) target bundleno = 1 (0x1), region = 62 }

// kernel: vision_transformer_forward.5
= control target key start
LH: loop header
LB: loop body
LE: loop exit
PB: predicated region body
PF: predicated region fallthrough
CT: control target
= control target key end

     0   :  { %s3479_s25 = smov 0   ;;  %s4187_s0 = inlined_call_operand.vmem [shape: bf16[2,64,32], index: 0, kind: input, shape index: {}]   ;;  %s4188_s1 = inlined_call_operand.vmem [shape: bf16[32,96], index: 1, kind: input, shape index: {}]   ;;  %s4189_s2 = inlined_call_operand.vmem [shape: f32[1,96], index: 2, kind: input, shape index: {}]   ;;  %s4190_s3 = inlined_call_operand.vmem [shape: bf16[32,32], index: 3, kind: input, shape index: {}]   ;;  %s4191_s4 = inlined_call_operand.vmem [shape: f32[1,32], index: 4, kind: input, shape index: {}]   ;;  %s4192_s5 = inlined_call_operand.vmem [shape: f32[1,32], index: 5, kind: input, shape index: {}]   ;;  %s4193_s6 = inlined_call_operand.vmem [shape: f32[1,32], index: 6, kind: input, shape index: {}]   ;;  %s4194_s7 = inlined_call_operand.vmem [shape: bf16[32,64], index: 7, kind: input, shape index: {}]   ;;  %s4195_s8 = inlined_call_operand.vmem [shape: f32[1,64], index: 8, kind: input, shape index: {}]   ;;  %s4196_s9 = inlined_call_operand.vmem [shape: bf16[64,32], index: 9, kind: input, shape index: {}]   ;;  %s4197_s10 = inlined_call_operand.vmem [shape: f32[1,32], index: 10, kind: input, shape index: {}]   ;;  %s4198_s11 = inlined_call_operand.vmem [shape: f32[1,32], index: 11, kind: input, shape index: {}]   ;;  %s4199_s12 = inlined_call_operand.vmem [shape: f32[1,32], index: 12, kind: input, shape index: {}]   ;;  %s4200_s13 = inlined_call_operand.vmem [shape: bf16[2,64,32], index: 13, kind: output, shape index: {}]  }
   0x1 LB: > { %s2726_s26 = sadd.s32 4294967295, %s3396_s25   ;;  %p2730_p0 = scmp.ge.s32.totalorder %s3396_s25, 1  ;;  %s3396_s25 = sphi %s3479_s25, %s23_s25  }
   0x2   : > { %p387_p1 = scmp.lt.s32.totalorder %s3396_s25, 3 }
   0x4   : > { %p388_p2 = pnand %p2730_p0, %p387_p1 }
   0x5   : > { %v3210_v0 = vld [vmem:[%s4188_s1] sm:$0xff] (!%p388_p2)   ;;  %p431_p3 = scmp.lt.s32.totalorder (!%p388_p2), %s2726_s26, 1  ;;  %v3211_v1 = vld [vmem:[%s4188_s1 + $0x8] sm:$0xff] (!%p388_p2)   ;;  %vm501_vm0 = vcmask (!%p388_p2), 261120   ;;  %vm607_vm1 = vcmask (!%p388_p2), 64512   ;;  %s3398_s20 = smov (!%p388_p2), 96  }
   0x6   : > { %391 = sbr.rel (%p388_p2) target bundleno = 3630 (0xe2e), region = 72  ;;  %2939 = vmatprep.subr.bf16.mxu0 (!%p388_p2), %v3210_v0  ;;  %v2735_v6 = vld [vmem:[%s4189_s2] ss:$0 sm:$0xff] (!%p388_p2)  ;;  %vm697_vm2 = vcmask (!%p388_p2), 523264   ;;  %s3399_s21 = smov (!%p388_p2), 64   ;;  %vm1191_vm3 = vcmask (!%p388_p2), 1043456  }
   0x7   : > { %2940 = vmatpush3.bf16.msra.mxu0 (!%p388_p2), %v3210_v0  ;;  %s3400_s22 = smov (!%p388_p2), 88   ;;  %s3401_s23 = smov (!%p388_p2), 120   ;;  %vm2662_vm4 = vcmask (!%p388_p2), 257024  }
   0x8   : > { %2941 = vmatprep.subr.bf16.mxu0 (!%p388_p2), %v3211_v1  ;;  %s3402_s24 = smov (!%p388_p2), 80   ;;  %s3403_s27 = smov (!%p388_p2), 112  }
   0x9   : > { %s3404_s28 = smov (!%p388_p2), 56   ;;  %s3405_s29 = smov (!%p388_p2), 72  }
   0xa   : > { %s3406_s30 = smov (!%p388_p2), 104   ;;  %s3407_s15 = smov (!%p388_p2), 48  }
   0xb   : > { %2942 = vmatpush3.bf16.msra.mxu0 (!%p388_p2), %v3211_v1 }
   0xd   : > { %s4202_s26 = smov (!%p431_p3, %s2726_s26), 1 }
   0xe   : > { %s2825_s14 = sshll.u32 %s4202_s26, 5 }
   0xf   : > { %s3501_s17 = scalar_lea.vmem %s4187_s0, %s2825_s14 }
  0x10   : > { %v442_v2 = vld [vmem:[%s3501_s17] sm:$0xff]   ;;  %v444_v3 = vld [vmem:[%s3501_s17 + $0x8] sm:$0xff]   ;;  %v446_v4 = vld [vmem:[%s3501_s17 + $0x10] sm:$0xff]  }
  0x11   : > { %2943 = vmatprep.mubr.msk.bf16.mxu0 %vm501_vm0, %v442_v2  ;;  %v448_v5 = vld [vmem:[%s3501_s17 + $0x18] sm:$0xff]  }
  0x12   : > { %2944 = vmatmul.mubr.msk.bf16.vlgmr.msra.gmra.mrb[0].mxu0 %vm501_vm0, %v444_v3 }
  0x13   : > { %2947 = vmatprep.mubr.msk.bf16.mxu0 %vm501_vm0, %v446_v4 }
  0x1a   : > { %2948 = vmatmul.mubr.msk.bf16.gmra.mrb[4].mxu0 %vm501_vm0, %v448_v5 }
  0xe5   : > { %v2945_v7 = vpop.f32.mrb[0].mxu0 }
  0xe6   : > { %v557_v8 = vadd.f32 %v2945_v7, %v2735_v6  ;;  %v548_v9 = vpop.f32.mrb[1].mxu0 }
  0xe7   : > { %v549_v10 = vadd.f32 %v2735_v6, %v548_v9  ;;  %v2946_v11 = vpop.f32.mrb[2].mxu0 }
  0xe8   : > { %v560_v12 = vadd.f32 %v2946_v11, %v2735_v6  ;;  %v551_v13 = vpop.f32.mrb[3].mxu0  ;;  %v581_v15 = vmul.f32 0.35355338, %v557_v8 }
  0xe9   : > { %v552_v14 = vadd.f32 %v2735_v6, %v551_v13  ;;  %v579_v18 = vmul.f32 0.35355338, %v549_v10 }
  0xea   : > { %v582_v16 = vmul.f32 0.35355338, %v560_v12  ;;  %v3514_v17 = vpack.c.bf16 %v560_v12, %v557_v8 }
  0xeb   : > { %v580_v19 = vmul.f32 0.35355338, %v552_v14  ;;  %v3516_v20 = vpack.c.bf16 %v552_v14, %v549_v10 }
  0xec   : > { %v3518_v21 = vpack.c.bf16 %v582_v16, %v581_v15 }
  0xed   : > { %v3520_v22 = vpack.c.bf16 %v580_v19, %v579_v18  ;;  %599 = vrot.lane.b32.xlu0 %v3516_v20, %s3398_s20  ;;  %v2949_v23 = vpop.f32.mrb[4].mxu0 }
  0xee   : > { %v573_v24 = vadd.f32 %v2949_v23, %v2735_v6  ;;  %v564_v25 = vpop.f32.mrb[5].mxu0 }
  0xef   : > { %v565_v26 = vadd.f32 %v2735_v6, %v564_v25  ;;  %2959 = vmatprep.mubr.msk.bf16.mxu1 %vm607_vm1, %v3520_v22  ;;  %v2950_v27 = vpop.f32.mrb[6].mxu0 }
  0xf0   : > { %v585_v28 = vmul.f32 0.35355338, %v573_v24  ;;  %v576_v29 = vadd.f32 %v2950_v27, %v2735_v6  ;;  %v567_v30 = vpop.f32.mrb[7].mxu0 }
  0xf1   : > { %v583_v31 = vmul.f32 0.35355338, %v565_v26  ;;  %v568_v32 = vadd.f32 %v2735_v6, %v567_v30  ;;  %601 = vrot.lane.b32.xlu0 %v3514_v17, %s3398_s20 }
  0xf2   : > { %v586_v33 = vmul.f32 0.35355338, %v576_v29  ;;  %v3526_v34 = vpack.c.bf16 %v576_v29, %v573_v24 }
  0xf3   : > { %v584_v35 = vmul.f32 0.35355338, %v568_v32  ;;  %v3528_v36 = vpack.c.bf16 %v568_v32, %v565_v26 }
  0xf4   : > { %v3530_v37 = vpack.c.bf16 %v586_v33, %v585_v28 }
  0xf5   : > { %v3532_v38 = vpack.c.bf16 %v584_v35, %v583_v31  ;;  %603 = vrot.lane.b32.xlu1 %v3528_v36, %s3398_s20 }
  0xf9   : > { %605 = vrot.lane.b32.xlu1 %v3526_v34, %s3398_s20 }
 0x15f   : > { %v600_v39 = vpop.permute.xlu0 %599 }
 0x160   : > { %3171 = vmatprep.subr.msk.bf16.mxu1 %vm607_vm1, %v600_v39  ;;  %v621_v40 = vsel %vm607_vm1, %v600_v39, 0 }
 0x161   : > { %2952 = vmatpush3.bf16.xpose.msra.mxu1 %v621_v40 }
 0x163   : > { %v602_v41 = vpop.permute.xlu0 %601 }
 0x164   : > { %3172 = vmatprep.subr.msk.bf16.mxu1 %vm607_vm1, %v602_v41  ;;  %v624_v42 = vsel %vm607_vm1, %v602_v41, 0 }
 0x167   : > { %v604_v43 = vpop.permute.xlu1 %603 }
 0x168   : > { %v627_v44 = vsel %vm607_vm1, %v604_v43, 0 }
 0x169   : > { %2954 = vmatpush3.bf16.xpose.msra.mxu1 %v624_v42 }
 0x16a   : > { %3173 = vmatprep.subr.msk.bf16.mxu1 %vm607_vm1, %v604_v43 }
 0x16b   : > { %v606_v45 = vpop.permute.xlu1 %605 }
 0x16c   : > { %v630_v46 = vsel %vm607_vm1, %v606_v45, 0 }
 0x171   : > { %2956 = vmatpush3.bf16.xpose.msra.mxu1 %v627_v44 }
 0x172   : > { %3174 = vmatprep.subr.msk.bf16.mxu1 %vm607_vm1, %v606_v45 }
 0x179   : > { %2958 = vmatpush3.bf16.xpose.msra.mxu1 %v630_v46 }
 0x180   : > { %2960 = vmatmul.mubr.msk.bf16.vlgmr.msra.gmra.mrb[0].mxu1 %vm607_vm1, %v3518_v21 }
 0x181   : > { %2963 = vmatprep.mubr.msk.bf16.mxu1 %vm607_vm1, %v3532_v38 }
 0x188   : > { %2964 = vmatmul.mubr.msk.bf16.gmra.mrb[4].mxu1 %vm607_vm1, %v3530_v37 }
 0x253   : > { %v2961_v47 = vpop.f32.mrb[0].mxu1 }
 0x254   : > { %v666_v48 = vpop.f32.mrb[1].mxu1  ;;  %v704_v49 = vsel %vm697_vm2, %v2961_v47, -inf }
 0x255   : > { %705 = vmax.xlane.f32.xlu0 %v704_v49  ;;  %v2962_v50 = vpop.f32.mrb[2].mxu1  ;;  %v698_v53 = vsel %vm697_vm2, %v666_v48, -inf }
 0x256   : > { %v669_v51 = vpop.f32.mrb[3].mxu1  ;;  %v707_v56 = vsel %vm697_vm2, %v2962_v50, -inf }
 0x257   : > { %v701_v52 = vsel %vm697_vm2, %v669_v51, -inf }
 0x258   : > { %702 = vmax.xlane.f32.xlu1 %v701_v52 }
 0x259   : > { %699 = vmax.xlane.f32.xlu0 %v698_v53 }
 0x25b   : > { %v2965_v54 = vpop.f32.mrb[4].mxu1 }
 0x25c   : > { %v682_v55 = vpop.f32.mrb[5].mxu1  ;;  %v716_v57 = vsel %vm697_vm2, %v2965_v54, -inf }
 0x25d   : > { %708 = vmax.xlane.f32.xlu0 %v707_v56  ;;  %717 = vmax.xlane.f32.xlu1 %v716_v57  ;;  %v2966_v58 = vpop.f32.mrb[6].mxu1  ;;  %v710_v61 = vsel %vm697_vm2, %v682_v55, -inf }
 0x25e   : > { %v3555_v59 = vpop.f32.mrb[7].mxu1  ;;  %v719_v62 = vsel %vm697_vm2, %v2966_v58, -inf }
 0x25f   : > { %v713_v60 = vsel %vm697_vm2, %v3555_v59, -inf }
 0x261   : > { %711 = vmax.xlane.f32.xlu1 %v710_v61  ;;  %714 = vmax.xlane.f32.xlu0 %v713_v60 }
 0x265   : > { %720 = vmax.xlane.f32.xlu0 %v719_v62 }
 0x272   : > { %790 = vrot.lane.b32.xlu1 %v3516_v20, %s3399_s21 }
 0x276   : > { %794 = vrot.lane.b32.xlu1 %v3528_v36, %s3399_s21 }
 0x27a   : > { %796 = vrot.lane.b32.xlu1 %v3526_v34, %s3399_s21 }
 0x27b   : > { %792 = vrot.lane.b32.xlu0 %v3514_v17, %s3399_s21 }
 0x27e   : > { %896 = vrot.lane.b32.xlu1 %v3516_v20, %s3400_s22 }
 0x2e2   : > { %v706_v63 = vpop.xlane.xlu0 %705 }
 0x2e3   : > { %v724_v0 = vsub.f32 %v2961_v47, %v706_v63 }
 0x2e5   : > { %v734_v1 = vmul.f32 1.442695, %v724_v0  ;;  %v703_v2 = vpop.xlane.xlu1 %702 }
 0x2e6   : > { %v700_v3 = vpop.xlane.xlu0 %699  ;;  %v723_v5 = vsub.f32 %v669_v51, %v703_v2 }
 0x2e7   : > { %3226 = vpow2.f32 %v734_v1  ;;  %v722_v4 = vsub.f32 %v666_v48, %v700_v3 }
 0x2e8   : > { %v732_v10 = vmul.f32 1.442695, %v723_v5 }
 0x2e9   : > { %v730_v6 = vmul.f32 1.442695, %v722_v4 }
 0x2ea   : > { %v709_v7 = vpop.xlane.xlu0 %708  ;;  %v718_v8 = vpop.xlane.xlu1 %717 }
 0x2eb   : > { %3228 = vpow2.f32 %v730_v6  ;;  %v725_v9 = vsub.f32 %v2962_v50, %v709_v7  ;;  %v728_v12 = vsub.f32 %v2965_v54, %v718_v8 }
 0x2ed   : > { %v736_v11 = vmul.f32 1.442695, %v725_v9  ;;  %v742_v16 = vmul.f32 1.442695, %v728_v12 }
 0x2ee   : > { %v712_v13 = vpop.xlane.xlu1 %711  ;;  %v715_v14 = vpop.xlane.xlu0 %714 }
 0x2ef   : > { %3230 = vpow2.f32 %v736_v11  ;;  %v726_v18 = vsub.f32 %v682_v55, %v712_v13  ;;  %v727_v48 = vsub.f32 %v3555_v59, %v715_v14 }
 0x2f0   : > { %3232 = vpow2.f32 %v732_v10 }
 0x2f1   : > { %v3567_v15 = vpop.eup %3226  ;;  %3234 = vpow2.f32 %v742_v16  ;;  %v738_v26 = vmul.f32 1.442695, %v726_v18  ;;  %v740_v49 = vmul.f32 1.442695, %v727_v48 }
 0x2f2   : > { %v791_v19 = vpop.permute.xlu1 %790  ;;  %v721_v23 = vpop.xlane.xlu0 %720  ;;  %v752_v24 = vsel %vm697_vm2, %v3567_v15, 0.0 }
 0x2f3   : > { %753 = vadd.xlane.f32.xlu1 %v752_v24  ;;  %2967 = vmatprep.subr.bf16.mxu0 %v791_v19  ;;  %v729_v27 = vsub.f32 %v2966_v58, %v721_v23  ;;  %3236 = vpow2.f32 %v738_v26 }
 0x2f4   : > { %2968 = vmatpush3.bf16.msra.mxu0 %v791_v19 }
 0x2f5   : > { %v3571_v25 = vpop.eup %3228  ;;  %v744_v32 = vmul.f32 1.442695, %v729_v27 }
 0x2f6   : > { %v795_v28 = vpop.permute.xlu1 %794  ;;  %v793_v29 = vpop.permute.xlu0 %792  ;;  %v746_v30 = vsel %vm697_vm2, %v3571_v25, 0.0 }
 0x2f7   : > { %747 = vadd.xlane.f32.xlu1 %v746_v30  ;;  %2969 = vmatprep.subr.bf16.mxu0 %v793_v29  ;;  %3238 = vpow2.f32 %v744_v32 }
 0x2f8   : > { %2970 = vmatpush3.bf16.msra.mxu0 %v793_v29  ;;  %3240 = vpow2.f32 %v740_v49 }
 0x2f9   : > { %v3575_v31 = vpop.eup %3230  ;;  %2971 = vmatprep.subr.bf16.mxu0 %v795_v28 }
 0x2fa   : > { %v797_v33 = vpop.permute.xlu1 %796  ;;  %v755_v35 = vsel %vm697_vm2, %v3575_v31, 0.0  ;;  %v3233_v39 = vpop.eup %3232 }
 0x2fb   : > { %756 = vadd.xlane.f32.xlu0 %v755_v35  ;;  %v749_v40 = vsel %vm697_vm2, %v3233_v39, 0.0  ;;  %v3580_v41 = vpop.eup %3234 }
 0x2fc   : > { %2972 = vmatpush3.bf16.msra.mxu0 %v795_v28  ;;  %v764_v43 = vsel %vm697_vm2, %v3580_v41, 0.0 }
 0x2fd   : > { %2973 = vmatprep.subr.bf16.mxu0 %v797_v33  ;;  %v3585_v44 = vpop.eup %3236 }
 0x2fe   : > { %v897_v42 = vpop.permute.xlu1 %896  ;;  %v758_v45 = vsel %vm697_vm2, %v3585_v44, 0.0 }
 0x2ff   : > { %750 = vadd.xlane.f32.xlu0 %v749_v40  ;;  %v917_v6 = vsel %vm607_vm1, %v897_v42, 0 }
 0x300   : > { %2974 = vmatpush3.bf16.msra.mxu0 %v797_v33 }
 0x301   : > { %3175 = vmatprep.subr.msk.bf16.mxu0 %vm607_vm1, %v897_v42  ;;  %v3589_v46 = vpop.eup %3238 }
 0x302   : > { %v767_v47 = vsel %vm697_vm2, %v3589_v46, 0.0  ;;  %v3599_v50 = vpop.eup %3240 }
 0x303   : > { %765 = vadd.xlane.f32.xlu0 %v764_v43  ;;  %v761_v51 = vsel %vm697_vm2, %v3599_v50, 0.0 }
 0x307   : > { %759 = vadd.xlane.f32.xlu0 %v758_v45 }
 0x308   : > { %900 = vrot.lane.b32.xlu1 %v3528_v36, %s3400_s22 }
 0x30b   : > { %768 = vadd.xlane.f32.xlu0 %v767_v47 }
 0x321   : > { %898 = vrot.lane.b32.xlu0 %v3514_v17, %s3400_s22 }
 0x325   : > { %888 = vrot.lane.b32.xlu0 %v3520_v22, %s3401_s23 }
 0x329   : > { %892 = vrot.lane.b32.xlu0 %v3532_v38, %s3401_s23 }
 0x32c   : > { %762 = vadd.xlane.f32.xlu1 %v761_v51 }
 0x32d   : > { %1348 = vrot.lane.b32.xlu0 %v3516_v20, %s3402_s24 }
 0x331   : > { %1352 = vrot.lane.b32.xlu0 %v3528_v36, %s3402_s24 }
 0x335   : > { %1340 = vrot.lane.b32.xlu0 %v3520_v22, %s3403_s27 }
 0x339   : > { %1344 = vrot.lane.b32.xlu0 %v3532_v38, %s3403_s27 }
 0x33d   : > { %902 = vrot.lane.b32.xlu1 %v3526_v34, %s3400_s22 }
 0x341   : > { %890 = vrot.lane.b32.xlu1 %v3518_v21, %s3401_s23 }
 0x345   : > { %894 = vrot.lane.b32.xlu1 %v3530_v37, %s3401_s23  ;;  %s3408_s23 = smov 40  }
 0x349   : > { %1350 = vrot.lane.b32.xlu1 %v3514_v17, %s3402_s24 }
 0x34d   : > { %1354 = vrot.lane.b32.xlu1 %v3526_v34, %s3402_s24 }
 0x351   : > { %1342 = vrot.lane.b32.xlu1 %v3518_v21, %s3403_s27 }
 0x355   : > { %1346 = vrot.lane.b32.xlu1 %v3530_v37, %s3403_s27 }
 0x380   : > { %v754_v52 = vpop.xlane.xlu1 %753 }
 0x384   : > { %v748_v53 = vpop.xlane.xlu1 %747 }
 0x388   : > { %v757_v54 = vpop.xlane.xlu0 %756  ;;  %v901_v8 = vpop.permute.xlu1 %900 }
 0x389   : > { %3242 = vrcp.f32 %v757_v54  ;;  %v923_v9 = vsel %vm607_vm1, %v901_v8, 0 }
 0x38a   : > { %3244 = vrcp.f32 %v748_v53 }
 0x38b   : > { %3246 = vrcp.f32 %v754_v52 }
 0x38c   : > { %v751_v55 = vpop.xlane.xlu0 %750 }
 0x38d   : > { %3248 = vrcp.f32 %v751_v55 }
 0x390   : > { %v766_v56 = vpop.xlane.xlu0 %765 }
 0x393   : > { %v3243_v57 = vpop.eup %3242 }
 0x394   : > { %v760_v58 = vpop.xlane.xlu0 %759  ;;  %v3245_v59 = vpop.eup %3244  ;;  %v781_v62 = vmul.f32 %v3243_v57, %v3575_v31 }
 0x395   : > { %v3247_v60 = vpop.eup %3246  ;;  %v778_v0 = vmul.f32 %v3245_v59, %v3571_v25 }
 0x396   : > { %v780_v2 = vmul.f32 %v3247_v60, %v3567_v15 }
 0x397   : > { %v3249_v61 = vpop.eup %3248 }
 0x398   : > { %v769_v63 = vpop.xlane.xlu0 %768  ;;  %v779_v1 = vmul.f32 %v3249_v61, %v3233_v39  ;;  %v787_v4 = vpack.c.bf16 %v781_v62, %v780_v2 }
 0x399   : > { %3250 = vrcp.f32 %v769_v63 }
 0x39a   : > { %v786_v3 = vpack.c.bf16 %v779_v1, %v778_v0  ;;  %3252 = vrcp.f32 %v760_v58 }
 0x39b   : > { %3254 = vrcp.f32 %v766_v56 }
 0x39c   : > { %2975 = vmatprep.mubr.msk.bf16.mxu0 %vm697_vm2, %v786_v3  ;;  %v899_v5 = vpop.permute.xlu0 %898 }
 0x39d   : > { %2976 = vmatmul.mubr.msk.bf16.vlgmr.msra.gmra.mrb[8].mxu0 %vm697_vm2, %v787_v4  ;;  %v920_v7 = vsel %vm607_vm1, %v899_v5, 0 }
 0x39e   : > { %2984 = vmatpush3.bf16.xpose.msra.mxu0 %v917_v6 }
 0x39f   : > { %3176 = vmatprep.subr.msk.bf16.mxu0 %vm607_vm1, %v899_v5 }
 0x3a0   : > { %v889_v10 = vpop.permute.xlu0 %888 }
 0x3a3   : > { %v3251_v16 = vpop.eup %3250 }
 0x3a4   : > { %v893_v11 = vpop.permute.xlu0 %892  ;;  %v3253_v18 = vpop.eup %3252  ;;  %v785_v24 = vmul.f32 %v3251_v16, %v3589_v46 }
 0x3a5   : > { %v3255_v19 = vpop.eup %3254  ;;  %v782_v25 = vmul.f32 %v3253_v18, %v3585_v44 }
 0x3a6   : > { %2986 = vmatpush3.bf16.xpose.msra.mxu0 %v920_v7  ;;  %v784_v27 = vmul.f32 %v3255_v19, %v3580_v41 }
 0x3a7   : > { %3177 = vmatprep.subr.msk.bf16.mxu0 %vm607_vm1, %v901_v8 }
 0x3a8   : > { %v1349_v15 = vpop.permute.xlu0 %1348  ;;  %v789_v30 = vpack.c.bf16 %v785_v24, %v784_v27 }
 0x3a9   : > { %v1369_v32 = vsel %vm607_vm1, %v1349_v15, 0 }
 0x3ac   : > { %v1353_v35 = vpop.permute.xlu0 %1352 }
 0x3ad   : > { %v1375_v41 = vsel %vm607_vm1, %v1353_v35, 0 }
 0x3ae   : > { %2988 = vmatpush3.bf16.xpose.msra.mxu0 %v923_v9 }
 0x3b0   : > { %v1341_v39 = vpop.permute.xlu0 %1340 }
 0x3b4   : > { %v1345_v45 = vpop.permute.xlu0 %1344 }
 0x3b9   : > { %v763_v12 = vpop.xlane.xlu1 %762 }
 0x3ba   : > { %3256 = vrcp.f32 %v763_v12 }
 0x3bd   : > { %v903_v13 = vpop.permute.xlu1 %902 }
 0x3be   : > { %3178 = vmatprep.subr.msk.bf16.mxu0 %vm607_vm1, %v903_v13  ;;  %v926_v14 = vsel %vm607_vm1, %v903_v13, 0 }
 0x3bf   : > { %2990 = vmatpush3.bf16.xpose.msra.mxu0 %v926_v14 }
 0x3c0   : > { %3181 = vmatprep.subr.msk.bf16.mxu0 %vm607_vm1, %v1349_v15 }
 0x3c1   : > { %v891_v28 = vpop.permute.xlu1 %890 }
 0x3c4   : > { %v3257_v23 = vpop.eup %3256 }
 0x3c5   : > { %v783_v26 = vmul.f32 %v3257_v23, %v3599_v50  ;;  %v895_v31 = vpop.permute.xlu1 %894 }
 0x3c7   : > { %v788_v29 = vpack.c.bf16 %v783_v26, %v782_v25 }
 0x3c9   : > { %2979 = vmatprep.mubr.msk.bf16.mxu0 %vm697_vm2, %v788_v29  ;;  %v1351_v33 = vpop.permute.xlu1 %1350 }
 0x3ca   : > { %2980 = vmatmul.mubr.msk.bf16.gmra.mrb[12].mxu0 %vm697_vm2, %v789_v30  ;;  %v1372_v40 = vsel %vm607_vm1, %v1351_v33, 0 }
 0x3cb   : > { %2991 = vmatprep.mubr.msk.bf16.mxu0 %vm607_vm1, %v889_v10 }
 0x3cd   : > { %v1355_v42 = vpop.permute.xlu1 %1354 }
 0x3ce   : > { %v1378_v43 = vsel %vm607_vm1, %v1355_v42, 0 }
 0x3d1   : > { %v1343_v44 = vpop.permute.xlu1 %1342 }
 0x3d2   : > { %2992 = vmatmul.mubr.msk.bf16.vlgmr.msra.gmra.mrb[16].mxu0 %vm607_vm1, %v891_v28 }
 0x3d3   : > { %3036 = vmatpush3.bf16.xpose.msra.mxu0 %v1369_v32  ;;  %2995 = vmatprep.mubr.msk.bf16.mxu0 %vm607_vm1, %v893_v11 }
 0x3d4   : > { %3182 = vmatprep.subr.msk.bf16.mxu0 %vm607_vm1, %v1351_v33 }
 0x3d5   : > { %v1347_v46 = vpop.permute.xlu1 %1346 }
 0x3da   : > { %2996 = vmatmul.mubr.msk.bf16.gmra.mrb[20].mxu0 %vm607_vm1, %v895_v31 }
 0x3db   : > { %3038 = vmatpush3.bf16.xpose.msra.mxu0 %v1372_v40  ;;  %3043 = vmatprep.mubr.msk.bf16.mxu0 %vm607_vm1, %v1341_v39 }
 0x3dc   : > { %3183 = vmatprep.subr.msk.bf16.mxu0 %vm607_vm1, %v1353_v35 }
 0x3e3   : > { %3040 = vmatpush3.bf16.xpose.msra.mxu0 %v1375_v41 }
 0x3e4   : > { %3184 = vmatprep.subr.msk.bf16.mxu0 %vm607_vm1, %v1355_v42 }
 0x3eb   : > { %3042 = vmatpush3.bf16.xpose.msra.mxu0 %v1378_v43 }
 0x3f2   : > { %3044 = vmatmul.mubr.msk.bf16.vlgmr.msra.gmra.mrb[24].mxu0 %vm607_vm1, %v1343_v44 }
 0x3f3   : > { %3047 = vmatprep.mubr.msk.bf16.mxu0 %vm607_vm1, %v1345_v45 }
 0x3fa   : > { %3048 = vmatmul.mubr.msk.bf16.gmra.mrb[28].mxu0 %vm607_vm1, %v1347_v46 }
 0x470   : > { %v3650_v47 = vpop.f32.mrb[8].mxu0 }
 0x471   : > { %v3652_v48 = vpop.f32.mrb[9].mxu0 }
 0x472   : > { %v3654_v49 = vpop.f32.mrb[10].mxu0 }
 0x473   : > { %v880_v50 = vpack.c.bf16 %v3654_v49, %v3650_v47  ;;  %v3658_v51 = vpop.f32.mrb[11].mxu0 }
 0x474   : > { %v879_v52 = vpack.c.bf16 %v3658_v51, %v3652_v48 }
 0x49d   : > { %v3662_v53 = vpop.f32.mrb[12].mxu0 }
 0x49e   : > { %v3664_v54 = vpop.f32.mrb[13].mxu0 }
 0x49f   : > { %v3666_v55 = vpop.f32.mrb[14].mxu0 }
 0x4a0   : > { %v882_v56 = vpack.c.bf16 %v3666_v55, %v3662_v53  ;;  %v3670_v57 = vpop.f32.mrb[15].mxu0 }
 0x4a1   : > { %v881_v58 = vpack.c.bf16 %v3670_v57, %v3664_v54 }
 0x4a5   : > { %v2993_v59 = vpop.f32.mrb[16].mxu0 }
 0x4a6   : > { %v962_v60 = vpop.f32.mrb[17].mxu0  ;;  %v999_v1 = vsel %vm697_vm2, %v2993_v59, -inf }
 0x4a7   : > { %v2994_v61 = vpop.f32.mrb[18].mxu0  ;;  %v993_v62 = vsel %vm697_vm2, %v962_v60, -inf }
 0x4a8   : > { %994 = vmax.xlane.f32.xlu0 %v993_v62  ;;  %v965_v63 = vpop.f32.mrb[19].mxu0  ;;  %v1002_v5 = vsel %vm697_vm2, %v2994_v61, -inf }
 0x4a9   : > { %v996_v0 = vsel %vm697_vm2, %v965_v63, -inf }
 0x4aa   : > { %997 = vmax.xlane.f32.xlu1 %v996_v0 }
 0x4ac   : > { %1000 = vmax.xlane.f32.xlu0 %v999_v1 }
 0x4ad   : > { %v2997_v2 = vpop.f32.mrb[20].mxu0 }
 0x4ae   : > { %v978_v3 = vpop.f32.mrb[21].mxu0  ;;  %v1011_v8 = vsel %vm697_vm2, %v2997_v2, -inf }
 0x4af   : > { %v2998_v4 = vpop.f32.mrb[22].mxu0  ;;  %v1005_v6 = vsel %vm697_vm2, %v978_v3, -inf }
 0x4b0   : > { %1003 = vmax.xlane.f32.xlu0 %v1002_v5  ;;  %1006 = vmax.xlane.f32.xlu1 %v1005_v6  ;;  %v981_v7 = vpop.f32.mrb[23].mxu0  ;;  %v1014_v10 = vsel %vm697_vm2, %v2998_v4, -inf }
 0x4b1   : > { %v1008_v9 = vsel %vm697_vm2, %v981_v7, -inf }
 0x4b4   : > { %1012 = vmax.xlane.f32.xlu1 %v1011_v8  ;;  %1009 = vmax.xlane.f32.xlu0 %v1008_v9 }
 0x4b8   : > { %1015 = vmax.xlane.f32.xlu0 %v1014_v10 }
 0x4c5   : > { %v3682_v11 = vpop.f32.mrb[24].mxu0  ;;  %1085 = vrot.lane.b32.xlu1 %v3516_v20, %s3404_s28 }
 0x4c6   : > { %v3686_v12 = vpop.f32.mrb[25].mxu0 }
 0x4c7   : > { %v3688_v13 = vpop.f32.mrb[26].mxu0 }
 0x4c8   : > { %v3690_v14 = vpop.f32.mrb[27].mxu0 }
 0x4cd   : > { %v3692_v15 = vpop.f32.mrb[28].mxu0 }
 0x4ce   : > { %v3694_v16 = vpop.f32.mrb[29].mxu0 }
 0x4cf   : > { %v3696_v18 = vpop.f32.mrb[30].mxu0 }
 0x4d0   : > { %v3698_v19 = vpop.f32.mrb[31].mxu0 }
 0x535   : > { %v995_v23 = vpop.xlane.xlu0 %994 }
 0x536   : > { %v1017_v24 = vsub.f32 %v962_v60, %v995_v23 }
 0x537   : > { %v998_v25 = vpop.xlane.xlu1 %997 }
 0x538   : > { %v1025_v28 = vmul.f32 1.442695, %v1017_v24  ;;  %v1018_v30 = vsub.f32 %v965_v63, %v998_v25 }
 0x539   : > { %v1001_v26 = vpop.xlane.xlu0 %1000 }
 0x53a   : > { %v1019_v27 = vsub.f32 %v2993_v59, %v1001_v26  ;;  %v1027_v40 = vmul.f32 1.442695, %v1018_v30  ;;  %v1457_v30 = vsel %vm697_vm2, %v3694_v16, -inf }
 0x53c   : > { %v1029_v29 = vmul.f32 1.442695, %v1019_v27 }
 0x53d   : > { %v1007_v31 = vpop.xlane.xlu1 %1006  ;;  %v1004_v32 = vpop.xlane.xlu0 %1003 }
 0x53e   : > { %3258 = vpow2.f32 %v1029_v29  ;;  %v1020_v33 = vsub.f32 %v2994_v61, %v1004_v32  ;;  %v1021_v35 = vsub.f32 %v978_v3, %v1007_v31  ;;  %v1445_v29 = vsel %vm697_vm2, %v3686_v12, -inf }
 0x53f   : > { %3260 = vpow2.f32 %v1025_v28  ;;  %v1448_v28 = vsel %vm697_vm2, %v3690_v14, -inf  ;;  %v1466_v31 = vsel %vm697_vm2, %v3696_v18, -inf }
 0x540   : > { %v1031_v39 = vmul.f32 1.442695, %v1020_v33  ;;  %v1033_v44 = vmul.f32 1.442695, %v1021_v35 }
 0x541   : > { %v1013_v41 = vpop.xlane.xlu1 %1012  ;;  %v1010_v42 = vpop.xlane.xlu0 %1009 }
 0x542   : > { %v1023_v43 = vsub.f32 %v2997_v2, %v1013_v41  ;;  %3262 = vpow2.f32 %v1031_v39  ;;  %v1022_v46 = vsub.f32 %v981_v7, %v1010_v42 }
 0x543   : > { %3264 = vpow2.f32 %v1027_v40 }
 0x544   : > { %v1037_v45 = vmul.f32 1.442695, %v1023_v43  ;;  %v1035_v0 = vmul.f32 1.442695, %v1022_v46 }
 0x545   : > { %v1086_v59 = vpop.permute.xlu1 %1085  ;;  %v1016_v60 = vpop.xlane.xlu0 %1015 }
 0x546   : > { %3266 = vpow2.f32 %v1037_v45  ;;  %v1024_v62 = vsub.f32 %v2998_v4, %v1016_v60  ;;  %2999 = vmatprep.subr.bf16.mxu1 %v1086_v59 }
 0x547   : > { %3000 = vmatpush3.bf16.msra.mxu1 %v1086_v59  ;;  %3268 = vpow2.f32 %v1033_v44 }
 0x548   : > { %v3700_v63 = vpop.eup %3258  ;;  %v1039_v61 = vmul.f32 1.442695, %v1024_v62 }
 0x549   : > { %v1047_v1 = vsel %vm697_vm2, %v3700_v63, 0.0  ;;  %v3704_v2 = vpop.eup %3260 }
 0x54a   : > { %3270 = vpow2.f32 %v1039_v61  ;;  %1048 = vadd.xlane.f32.xlu1 %v1047_v1  ;;  %v1041_v4 = vsel %vm697_vm2, %v3704_v2, 0.0 }
 0x54b   : > { %3272 = vpow2.f32 %v1035_v0 }
 0x54c   : > { %v3706_v3 = vpop.eup %3262 }
 0x54d   : > { %v1050_v5 = vsel %vm697_vm2, %v3706_v3, 0.0  ;;  %v3712_v6 = vpop.eup %3264 }
 0x54e   : > { %1042 = vadd.xlane.f32.xlu1 %v1041_v4  ;;  %1051 = vadd.xlane.f32.xlu0 %v1050_v5  ;;  %v1044_v10 = vsel %vm697_vm2, %v3712_v6, 0.0 }
 0x550   : > { %v3714_v7 = vpop.eup %3266 }
 0x551   : > { %v1059_v8 = vsel %vm697_vm2, %v3714_v7, 0.0  ;;  %v3718_v9 = vpop.eup %3268 }
 0x552   : > { %1060 = vadd.xlane.f32.xlu1 %v1059_v8  ;;  %1045 = vadd.xlane.f32.xlu0 %v1044_v10  ;;  %v1053_v24 = vsel %vm697_vm2, %v3718_v9, 0.0 }
 0x554   : > { %v3722_v23 = vpop.eup %3270 }
 0x555   : > { %v1062_v25 = vsel %vm697_vm2, %v3722_v23, 0.0  ;;  %v3728_v26 = vpop.eup %3272 }
 0x556   : > { %1054 = vadd.xlane.f32.xlu1 %v1053_v24  ;;  %1063 = vadd.xlane.f32.xlu0 %v1062_v25  ;;  %v1056_v27 = vsel %vm697_vm2, %v3728_v26, 0.0 }
 0x55a   : > { %1057 = vadd.xlane.f32.xlu0 %v1056_v27 }
 0x567   : > { %1089 = vrot.lane.b32.xlu1 %v3528_v36, %s3404_s28 }
 0x56b   : > { %1091 = vrot.lane.b32.xlu1 %v3526_v34, %s3404_s28 }
 0x56f   : > { %1729 = vrot.lane.b32.xlu1 %v3514_v17, %s3405_s29 }
 0x570   : > { %1087 = vrot.lane.b32.xlu0 %v3514_v17, %s3404_s28  ;;  %s4161_s28 = scalar_lea.vmem %s4200_s13, %s2825_s14 }
 0x573   : > { %1733 = vrot.lane.b32.xlu1 %v3526_v34, %s3405_s29 }
 0x574   : > { %1727 = vrot.lane.b32.xlu0 %v3516_v20, %s3405_s29 }
 0x577   : > { %1721 = vrot.lane.b32.xlu1 %v3518_v21, %s3406_s30  ;;  %v1451_v21 = vsel %vm697_vm2, %v3682_v11, -inf }
 0x578   : > { %1731 = vrot.lane.b32.xlu0 %v3528_v36, %s3405_s29 }
 0x57b   : > { %1725 = vrot.lane.b32.xlu1 %v3530_v37, %s3406_s30  ;;  %v1454_v37 = vsel %vm697_vm2, %v3688_v13, -inf }
 0x57c   : > { %1719 = vrot.lane.b32.xlu0 %v3520_v22, %s3406_s30  ;;  %v1463_v22 = vsel %vm697_vm2, %v3692_v15, -inf }
 0x580   : > { %1723 = vrot.lane.b32.xlu0 %v3532_v38, %s3406_s30  ;;  %v1460_v38 = vsel %vm697_vm2, %v3698_v19, -inf }
 0x59f   : > { %1449 = vmax.xlane.f32.xlu1 %v1448_v28  ;;  %1446 = vmax.xlane.f32.xlu0 %v1445_v29 }
 0x5a3   : > { %1458 = vmax.xlane.f32.xlu1 %v1457_v30  ;;  %1452 = vmax.xlane.f32.xlu0 %v1451_v21 }
 0x5a7   : > { %1464 = vmax.xlane.f32.xlu1 %v1463_v22  ;;  %1455 = vmax.xlane.f32.xlu0 %v1454_v37 }
 0x5ab   : > { %1461 = vmax.xlane.f32.xlu0 %v1460_v38 }
 0x5af   : > { %1467 = vmax.xlane.f32.xlu0 %v1466_v31 }
 0x5b8   : > { %1537 = vrot.lane.b32.xlu1 %v3516_v20, %s3407_s15 }
 0x5d7   : > { %v1049_v32 = vpop.xlane.xlu1 %1048 }
 0x5db   : > { %v1043_v33 = vpop.xlane.xlu1 %1042  ;;  %v1052_v35 = vpop.xlane.xlu0 %1051 }
 0x5dc   : > { %3274 = vrcp.f32 %v1043_v33 }
 0x5df   : > { %v1061_v39 = vpop.xlane.xlu1 %1060  ;;  %v1046_v40 = vpop.xlane.xlu0 %1045 }
 0x5e0   : > { %3276 = vrcp.f32 %v1046_v40 }
 0x5e1   : > { %3278 = vrcp.f32 %v1052_v35 }
 0x5e2   : > { %3280 = vrcp.f32 %v1049_v32 }
 0x5e3   : > { %v1055_v41 = vpop.xlane.xlu1 %1054  ;;  %v1064_v42 = vpop.xlane.xlu0 %1063 }
 0x5e4   : > { %3282 = vrcp.f32 %v1055_v41 }
 0x5e6   : > { %v3275_v45 = vpop.eup %3274 }
 0x5e7   : > { %v1090_v43 = vpop.permute.xlu1 %1089  ;;  %v1058_v44 = vpop.xlane.xlu0 %1057  ;;  %v1073_v62 = vmul.f32 %v3275_v45, %v3704_v2 }
 0x5e8   : > { %3284 = vrcp.f32 %v1058_v44 }
 0x5e9   : > { %3286 = vrcp.f32 %v1064_v42 }
 0x5ea   : > { %v3277_v46 = vpop.eup %3276  ;;  %3288 = vrcp.f32 %v1061_v39 }
 0x5eb   : > { %v1092_v59 = vpop.permute.xlu1 %1091  ;;  %v1088_v60 = vpop.permute.xlu0 %1087  ;;  %v1074_v61 = vmul.f32 %v3277_v46, %v3712_v6 }
 0x5ec   : > { %3001 = vmatprep.subr.bf16.mxu1 %v1088_v60  ;;  %v3279_v1 = vpop.eup %3278 }
 0x5ed   : > { %3002 = vmatpush3.bf16.msra.mxu1 %v1088_v60  ;;  %v1081_v0 = vpack.c.bf16 %v1074_v61, %v1073_v62  ;;  %v3281_v5 = vpop.eup %3280  ;;  %v1076_v6 = vmul.f32 %v3279_v1, %v3706_v3 }
 0x5ee   : > { %3003 = vmatprep.subr.bf16.mxu1 %v1090_v43  ;;  %v3283_v10 = vpop.eup %3282  ;;  %v1075_v28 = vmul.f32 %v3281_v5, %v3700_v63 }
 0x5ef   : > { %3007 = vmatprep.mubr.msk.bf16.mxu1 %vm697_vm2, %v1081_v0  ;;  %v1728_v4 = vpop.permute.xlu0 %1727  ;;  %v1730_v24 = vpop.permute.xlu1 %1729  ;;  %v1077_v29 = vmul.f32 %v3283_v10, %v3718_v9 }
 0x5f0   : > { %v1748_v8 = vsel %vm607_vm1, %v1728_v4, 0  ;;  %3186 = vmatprep.subr.msk.bf16.mxu0 %vm607_vm1, %v1728_v4  ;;  %v1082_v30 = vpack.c.bf16 %v1076_v6, %v1075_v28  ;;  %v1751_v38 = vsel %vm607_vm1, %v1730_v24, 0 }
 0x5f1   : > { %3004 = vmatpush3.bf16.msra.mxu1 %v1090_v43  ;;  %3078 = vmatpush3.bf16.xpose.msra.mxu0 %v1748_v8 }
 0x5f2   : > { %v3285_v2 = vpop.eup %3284  ;;  %3005 = vmatprep.subr.bf16.mxu1 %v1092_v59  ;;  %3187 = vmatprep.subr.msk.bf16.mxu0 %vm607_vm1, %v1730_v24 }
 0x5f3   : > { %v1732_v25 = vpop.permute.xlu0 %1731  ;;  %v1078_v27 = vmul.f32 %v3285_v2, %v3728_v26  ;;  %v3287_v21 = vpop.eup %3286 }
 0x5f4   : > { %v3289_v3 = vpop.eup %3288  ;;  %v1080_v63 = vmul.f32 %v3287_v21, %v3722_v23  ;;  %v1754_v31 = vsel %vm607_vm1, %v1732_v25, 0  ;;  %v1734_v32 = vpop.permute.xlu1 %1733 }
 0x5f5   : > { %3006 = vmatpush3.bf16.msra.mxu1 %v1092_v59  ;;  %v1083_v37 = vpack.c.bf16 %v1078_v27, %v1077_v29  ;;  %v1079_v9 = vmul.f32 %v3289_v3, %v3714_v7  ;;  %v1757_v33 = vsel %vm607_vm1, %v1734_v32, 0  ;;  %v1178_v3 = vld [vmem:[%s4190_s3 + $0x4] sm:$0xf] }
 0x5f6   : > { %3179 = vmatprep.subr.msk.bf16.mxu1 %vm1191_vm3, %v1178_v3 }
 0x5f7   : > { %v1720_v22 = vpop.permute.xlu0 %1719  ;;  %v1084_v26 = vpack.c.bf16 %v1080_v63, %v1079_v9  ;;  %v1193_v9 = vsel %vm1191_vm3, %v1178_v3, 0 }
 0x5f8   : > { %3008 = vmatmul.mubr.msk.bf16.vlgmr.msra.gmra.mrb[8].mxu1 %vm697_vm2, %v1082_v30  ;;  %3085 = vmatprep.mubr.msk.bf16.mxu0 %vm607_vm1, %v1720_v22  ;;  %v1722_v35 = vpop.permute.xlu1 %1721 }
 0x5f9   : > { %3011 = vmatprep.mubr.msk.bf16.mxu1 %vm697_vm2, %v1083_v37  ;;  %3080 = vmatpush3.bf16.xpose.msra.mxu0 %v1751_v38 }
 0x5fa   : > { %3188 = vmatprep.subr.msk.bf16.mxu0 %vm607_vm1, %v1732_v25  ;;  %3016 = vmatpush3.bf16.msra.mxu1 %v1193_v9 }
 0x5fb   : > { %v1724_v39 = vpop.permute.xlu0 %1723 }
 0x5fc   : > { %v1726_v23 = vpop.permute.xlu1 %1725 }
 0x600   : > { %3012 = vmatmul.mubr.msk.bf16.gmra.mrb[12].mxu1 %vm697_vm2, %v1084_v26 }
 0x601   : > { %3082 = vmatpush3.bf16.xpose.msra.mxu0 %v1754_v31  ;;  %v883_v31 = vld [vmem:[%s4190_s3] sm:$0xf] }
 0x602   : > { %3189 = vmatprep.subr.msk.bf16.mxu0 %vm607_vm1, %v1734_v32  ;;  %3180 = vmatprep.subr.msk.bf16.mxu1 %vm1191_vm3, %v883_v31 }
 0x609   : > { %3084 = vmatpush3.bf16.xpose.msra.mxu0 %v1757_v33 }
 0x610   : > { %3086 = vmatmul.mubr.msk.bf16.vlgmr.msra.gmra.mrb[32].mxu0 %vm607_vm1, %v1722_v35 }
 0x611   : > { %3089 = vmatprep.mubr.msk.bf16.mxu0 %vm607_vm1, %v1724_v39 }
 0x618   : > { %3090 = vmatmul.mubr.msk.bf16.gmra.mrb[36].mxu0 %vm607_vm1, %v1726_v23 }
 0x62c   : > { %v1450_v7 = vpop.xlane.xlu1 %1449  ;;  %v1447_v40 = vpop.xlane.xlu0 %1446 }
 0x62d   : > { %v1469_v41 = vsub.f32 %v3686_v12, %v1447_v40  ;;  %v1470_v45 = vsub.f32 %v3690_v14, %v1450_v7 }
 0x62f   : > { %v1477_v46 = vmul.f32 1.442695, %v1469_v41  ;;  %v1479_v1 = vmul.f32 1.442695, %v1470_v45 }
 0x630   : > { %v1459_v42 = vpop.xlane.xlu1 %1458  ;;  %v1453_v43 = vpop.xlane.xlu0 %1452 }
 0x631   : > { %v1471_v44 = vsub.f32 %v3682_v11, %v1453_v43  ;;  %v1473_v4 = vsub.f32 %v3694_v16, %v1459_v42  ;;  %v1273_v42 = vsel %vm1191_vm3, %v883_v31, 0 }
 0x633   : > { %v1481_v59 = vmul.f32 1.442695, %v1471_v44  ;;  %v1485_v11 = vmul.f32 1.442695, %v1473_v4 }
 0x634   : > { %v1465_v60 = vpop.xlane.xlu1 %1464  ;;  %v1456_v61 = vpop.xlane.xlu0 %1455 }
 0x635   : > { %v1475_v62 = vsub.f32 %v3692_v15, %v1465_v60  ;;  %3290 = vpow2.f32 %v1481_v59  ;;  %v1472_v0 = vsub.f32 %v3688_v13, %v1456_v61 }
 0x636   : > { %3292 = vpow2.f32 %v1477_v46 }
 0x637   : > { %v1489_v12 = vmul.f32 1.442695, %v1475_v62  ;;  %v1483_v5 = vmul.f32 1.442695, %v1472_v0 }
 0x638   : > { %v1462_v8 = vpop.xlane.xlu0 %1461  ;;  %v1538_v32 = vpop.permute.xlu1 %1537 }
 0x639   : > { %3294 = vpow2.f32 %v1483_v5  ;;  %v1474_v14 = vsub.f32 %v3698_v19, %v1462_v8 }
 0x63a   : > { %3296 = vpow2.f32 %v1479_v1 }
 0x63b   : > { %3298 = vpow2.f32 %v1489_v12  ;;  %v1487_v13 = vmul.f32 1.442695, %v1474_v14 }
 0x63c   : > { %v1468_v10 = vpop.xlane.xlu0 %1467  ;;  %3300 = vpow2.f32 %v1485_v11 }
 0x63d   : > { %v1476_v15 = vsub.f32 %v3696_v18, %v1468_v10 }
 0x63f   : > { %v3796_v24 = vpop.eup %3290  ;;  %v1491_v2 = vmul.f32 1.442695, %v1476_v15 }
 0x640   : > { %v1499_v16 = vsel %vm697_vm2, %v3796_v24, 0.0  ;;  %v3800_v6 = vpop.eup %3292 }
 0x641   : > { %3302 = vpow2.f32 %v1491_v2  ;;  %1500 = vadd.xlane.f32.xlu1 %v1499_v16  ;;  %v1493_v18 = vsel %vm697_vm2, %v3800_v6, 0.0 }
 0x642   : > { %3304 = vpow2.f32 %v1487_v13 }
 0x643   : > { %v3802_v25 = vpop.eup %3294 }
 0x644   : > { %v3804_v27 = vpop.eup %3296  ;;  %v1502_v19 = vsel %vm697_vm2, %v3802_v25, 0.0 }
 0x645   : > { %v3810_v28 = vpop.eup %3298  ;;  %1494 = vadd.xlane.f32.xlu1 %v1493_v18  ;;  %1503 = vadd.xlane.f32.xlu0 %v1502_v19  ;;  %v1496_v30 = vsel %vm697_vm2, %v3804_v27, 0.0 }
 0x646   : > { %v1511_v29 = vsel %vm697_vm2, %v3810_v28, 0.0  ;;  %v3816_v21 = vpop.eup %3300 }
 0x647   : > { %v1505_v37 = vsel %vm697_vm2, %v3816_v21, 0.0 }
 0x649   : > { %1512 = vadd.xlane.f32.xlu1 %v1511_v29  ;;  %1497 = vadd.xlane.f32.xlu0 %v1496_v30 }
 0x64b   : > { %v3818_v22 = vpop.eup %3302 }
 0x64c   : > { %v1514_v38 = vsel %vm697_vm2, %v3818_v22, 0.0  ;;  %v3827_v63 = vpop.eup %3304 }
 0x64d   : > { %1506 = vadd.xlane.f32.xlu1 %v1505_v37  ;;  %1515 = vadd.xlane.f32.xlu0 %v1514_v38  ;;  %v1508_v26 = vsel %vm697_vm2, %v3827_v63, 0.0 }
 0x651   : > { %1509 = vadd.xlane.f32.xlu0 %v1508_v26 }
 0x65e   : > { %1541 = vrot.lane.b32.xlu1 %v3528_v36, %s3407_s15 }
 0x662   : > { %1543 = vrot.lane.b32.xlu1 %v3526_v34, %s3407_s15 }
 0x667   : > { %1539 = vrot.lane.b32.xlu0 %v3514_v17, %s3407_s15 }
 0x6cb   : > { %v3009_v33 = vpop.f32.mrb[8].mxu1 }
 0x6cc   : > { %v1143_v35 = vpop.f32.mrb[9].mxu1 }
 0x6cd   : > { %v3010_v39 = vpop.f32.mrb[10].mxu1 }
 0x6ce   : > { %v1175_v23 = vpack.c.bf16 %v3010_v39, %v3009_v33  ;;  %v1146_v7 = vpop.f32.mrb[11].mxu1  ;;  %v1501_v40 = vpop.xlane.xlu1 %1500  ;;  %v1630_v39 = vld [vmem:[%s4190_s3 + $0x8] sm:$0xf] }
 0x6cf   : > { %v1174_v41 = vpack.c.bf16 %v1146_v7, %v1143_v35 }
 0x6d1   : > { %3017 = vmatprep.mubr.msk.bf16.mxu1 %vm607_vm1, %v1174_v41 }
 0x6d2   : > { %3018 = vmatmul.mubr.msk.bf16.vlgmr.msra.gmra.mrb[16].mxu1 %vm607_vm1, %v1175_v23  ;;  %v1504_v43 = vpop.xlane.xlu0 %1503  ;;  %v1495_v44 = vpop.xlane.xlu1 %1494  ;;  %v1644_v23 = vsel %vm1191_vm3, %v1630_v39, 0 }
 0x6d3   : > { %3026 = vmatpush3.bf16.msra.mxu1 %v1273_v42  ;;  %v3013_v45 = vpop.f32.mrb[12].mxu1 }
 0x6d4   : > { %3051 = vmatprep.subr.bf16.mxu1 %v1538_v32  ;;  %v1159_v46 = vpop.f32.mrb[13].mxu1 }
 0x6d5   : > { %v3014_v59 = vpop.f32.mrb[14].mxu1 }
 0x6d6   : > { %v1177_v60 = vpack.c.bf16 %v3014_v59, %v3013_v45  ;;  %v1162_v62 = vpop.f32.mrb[15].mxu1  ;;  %v1498_v0 = vpop.xlane.xlu0 %1497 }
 0x6d7   : > { %v1176_v61 = vpack.c.bf16 %v1162_v62, %v1159_v46  ;;  %3306 = vrcp.f32 %v1498_v0  ;;  %v1513_v1 = vpop.xlane.xlu1 %1512 }
 0x6d8   : > { %3308 = vrcp.f32 %v1495_v44 }
 0x6d9   : > { %3021 = vmatprep.mubr.msk.bf16.mxu1 %vm607_vm1, %v1176_v61  ;;  %3310 = vrcp.f32 %v1504_v43 }
 0x6da   : > { %3022 = vmatmul.mubr.msk.bf16.gmra.mrb[20].mxu1 %vm607_vm1, %v1177_v60  ;;  %v1516_v4 = vpop.xlane.xlu0 %1515 }
 0x6db   : > { %3027 = vmatprep.mubr.msk.bf16.mxu1 %vm607_vm1, %v879_v52  ;;  %v1507_v12 = vpop.xlane.xlu1 %1506 }
 0x6de   : > { %v1510_v5 = vpop.xlane.xlu0 %1509 }
 0x6df   : > { %3312 = vrcp.f32 %v1510_v5  ;;  %v1542_v14 = vpop.permute.xlu1 %1541 }
 0x6e0   : > { %3314 = vrcp.f32 %v1501_v40 }
 0x6e1   : > { %v3307_v8 = vpop.eup %3306  ;;  %3316 = vrcp.f32 %v1507_v12 }
 0x6e2   : > { %3028 = vmatmul.mubr.msk.bf16.vlgmr.msra.gmra.mrb[16].mxu1 %vm607_vm1, %v880_v50  ;;  %v1540_v11 = vpop.permute.xlu0 %1539  ;;  %v3309_v51 = vpop.eup %3308  ;;  %v1526_v49 = vmul.f32 %v3307_v8, %v3804_v27  ;;  %3318 = vrcp.f32 %v1516_v4 }
 0x6e3   : > { %3052 = vmatpush3.bf16.msra.mxu1 %v1538_v32  ;;  %3031 = vmatprep.mubr.msk.bf16.mxu1 %vm607_vm1, %v881_v58  ;;  %v3860_v48 = vpop.f32.mrb[32].mxu0  ;;  %v1525_v57 = vmul.f32 %v3309_v51, %v3800_v6  ;;  %v3311_v13 = vpop.eup %3310  ;;  %3320 = vrcp.f32 %v1513_v1 }
 0x6e4   : > { %3053 = vmatprep.subr.bf16.mxu1 %v1540_v11  ;;  %v3862_v52 = vpop.f32.mrb[33].mxu0  ;;  %v1830_v58 = vsel %vm697_vm2, %v3860_v48, -inf  ;;  %v1544_v16 = vpop.permute.xlu1 %1543  ;;  %v1528_v29 = vmul.f32 %v3311_v13, %v3802_v25 }
 0x6e5   : > { %v3864_v10 = vpop.f32.mrb[34].mxu0  ;;  %v1824_v47 = vsel %vm697_vm2, %v3862_v52, -inf  ;;  %v1533_v15 = vpack.c.bf16 %v1526_v49, %v1525_v57 }
 0x6e6   : > { %v3869_v50 = vpop.f32.mrb[35].mxu0  ;;  %1825 = vmax.xlane.f32.xlu0 %v1824_v47  ;;  %v1833_v53 = vsel %vm697_vm2, %v3864_v10, -inf }
 0x6e7   : > { %3054 = vmatpush3.bf16.msra.mxu1 %v1540_v11  ;;  %v1827_v54 = vsel %vm697_vm2, %v3869_v50, -inf }
 0x6e8   : > { %3055 = vmatprep.subr.bf16.mxu1 %v1542_v14  ;;  %1828 = vmax.xlane.f32.xlu1 %v1827_v54 }
 0x6e9   : > { %v3313_v2 = vpop.eup %3312 }
 0x6ea   : > { %3032 = vmatmul.mubr.msk.bf16.gmra.mrb[20].mxu1 %vm607_vm1, %v882_v56  ;;  %1831 = vmax.xlane.f32.xlu0 %v1830_v58  ;;  %v3315_v27 = vpop.eup %3314  ;;  %v1530_v56 = vmul.f32 %v3313_v2, %v3827_v63 }
 0x6eb   : > { %3056 = vmatpush3.bf16.msra.mxu1 %v1542_v14  ;;  %3059 = vmatprep.mubr.msk.bf16.mxu1 %vm697_vm2, %v1533_v15  ;;  %v3091_v6 = vpop.f32.mrb[36].mxu0  ;;  %v3317_v19 = vpop.eup %3316  ;;  %v1527_v38 = vmul.f32 %v3315_v27, %v3796_v24 }
 0x6ec   : > { %3057 = vmatprep.subr.bf16.mxu1 %v1544_v16  ;;  %v1809_v18 = vpop.f32.mrb[37].mxu0  ;;  %v1529_v3 = vmul.f32 %v3317_v19, %v3816_v21  ;;  %v1842_v25 = vsel %vm697_vm2, %v3091_v6, -inf  ;;  %v3319_v31 = vpop.eup %3318 }
 0x6ed   : > { %v3882_v30 = vpop.f32.mrb[38].mxu0  ;;  %v1836_v37 = vsel %vm697_vm2, %v1809_v18, -inf  ;;  %v1534_v9 = vpack.c.bf16 %v1528_v29, %v1527_v38  ;;  %v3321_v33 = vpop.eup %3320  ;;  %v1532_v63 = vmul.f32 %v3319_v31, %v3818_v22 }
 0x6ee   : > { %v1812_v55 = vpop.f32.mrb[39].mxu0  ;;  %1837 = vmax.xlane.f32.xlu1 %v1836_v37  ;;  %1834 = vmax.xlane.f32.xlu0 %v1833_v53  ;;  %v1535_v32 = vpack.c.bf16 %v1530_v56, %v1529_v3  ;;  %v1845_v24 = vsel %vm697_vm2, %v3882_v30, -inf  ;;  %v1531_v21 = vmul.f32 %v3321_v33, %v3810_v28 }
 0x6ef   : > { %3058 = vmatpush3.bf16.msra.mxu1 %v1544_v16  ;;  %v1839_v26 = vsel %vm697_vm2, %v1812_v55, -inf }
 0x6f0   : > { %v1536_v35 = vpack.c.bf16 %v1532_v63, %v1531_v21  ;;  %3185 = vmatprep.subr.msk.bf16.mxu1 %vm1191_vm3, %v1630_v39 }
 0x6f2   : > { %1843 = vmax.xlane.f32.xlu1 %v1842_v25  ;;  %1840 = vmax.xlane.f32.xlu0 %v1839_v26 }
 0x6f3   : > { %3060 = vmatmul.mubr.msk.bf16.vlgmr.msra.gmra.mrb[24].mxu1 %vm697_vm2, %v1534_v9 }
 0x6f4   : > { %3063 = vmatprep.mubr.msk.bf16.mxu1 %vm697_vm2, %v1535_v32  ;;  %3068 = vmatpush3.bf16.msra.mxu1 %v1644_v23 }
 0x6f6   : > { %1846 = vmax.xlane.f32.xlu0 %v1845_v24 }
 0x6fb   : > { %3064 = vmatmul.mubr.msk.bf16.gmra.mrb[28].mxu1 %vm697_vm2, %v1536_v35 }
 0x703   : > { %1916 = vrot.lane.b32.xlu1 %v3516_v20, %s3408_s23 }
 0x773   : > { %v1826_v22 = vpop.xlane.xlu0 %1825 }
 0x774   : > { %v1848_v7 = vsub.f32 %v3862_v52, %v1826_v22 }
 0x775   : > { %v1829_v28 = vpop.xlane.xlu1 %1828 }
 0x776   : > { %v1856_v42 = vmul.f32 1.442695, %v1848_v7  ;;  %v1849_v44 = vsub.f32 %v3869_v50, %v1829_v28 }
 0x777   : > { %v1832_v40 = vpop.xlane.xlu0 %1831 }
 0x778   : > { %v1850_v41 = vsub.f32 %v3860_v48, %v1832_v40  ;;  %v1858_v62 = vmul.f32 1.442695, %v1849_v44 }
 0x77a   : > { %v1860_v43 = vmul.f32 1.442695, %v1850_v41 }
 0x77b   : > { %v1838_v45 = vpop.xlane.xlu1 %1837  ;;  %v1835_v46 = vpop.xlane.xlu0 %1834 }
 0x77c   : > { %3322 = vpow2.f32 %v1860_v43  ;;  %v1851_v20 = vsub.f32 %v3864_v10, %v1835_v46  ;;  %v1852_v59 = vsub.f32 %v1809_v18, %v1838_v45 }
 0x77d   : > { %3324 = vpow2.f32 %v1856_v42 }
 0x77e   : > { %v1862_v60 = vmul.f32 1.442695, %v1851_v20  ;;  %v1864_v4 = vmul.f32 1.442695, %v1852_v59  ;;  %v2009_v59 = vld [vmem:[%s4190_s3 + $0xc] sm:$0xf] }
 0x77f   : > { %v1844_v61 = vpop.xlane.xlu1 %1843  ;;  %v1841_v0 = vpop.xlane.xlu0 %1840 }
 0x780   : > { %v1854_v1 = vsub.f32 %v3091_v6, %v1844_v61  ;;  %3326 = vpow2.f32 %v1862_v60  ;;  %v1853_v5 = vsub.f32 %v1812_v55, %v1841_v0  ;;  %v2023_v0 = vsel %vm1191_vm3, %v2009_v59, 0 }
 0x781   : > { %3328 = vpow2.f32 %v1858_v62 }
 0x782   : > { %v1868_v12 = vmul.f32 1.442695, %v1854_v1  ;;  %v1866_v14 = vmul.f32 1.442695, %v1853_v5 }
 0x783   : > { %v1917_v8 = vpop.permute.xlu1 %1916  ;;  %v1847_v11 = vpop.xlane.xlu0 %1846 }
 0x784   : > { %3330 = vpow2.f32 %v1868_v12  ;;  %v1855_v48 = vsub.f32 %v3882_v30, %v1847_v11  ;;  %3093 = vmatprep.subr.bf16.mxu1 %v1917_v8 }
 0x785   : > { %3332 = vpow2.f32 %v1864_v4 }
 0x786   : > { %v3911_v51 = vpop.eup %3322  ;;  %v1870_v52 = vmul.f32 1.442695, %v1855_v48 }
 0x787   : > { %v1878_v10 = vsel %vm697_vm2, %v3911_v51, 0.0  ;;  %v3325_v47 = vpop.eup %3324 }
 0x788   : > { %3334 = vpow2.f32 %v1870_v52  ;;  %1879 = vadd.xlane.f32.xlu1 %v1878_v10  ;;  %v1872_v50 = vsel %vm697_vm2, %v3325_v47, 0.0 }
 0x789   : > { %3336 = vpow2.f32 %v1866_v14 }
 0x78a   : > { %v3915_v49 = vpop.eup %3326 }
 0x78b   : > { %v1881_v54 = vsel %vm697_vm2, %v3915_v49, 0.0  ;;  %v3329_v57 = vpop.eup %3328 }
 0x78c   : > { %1873 = vadd.xlane.f32.xlu1 %v1872_v50  ;;  %1882 = vadd.xlane.f32.xlu0 %v1881_v54  ;;  %v1875_v2 = vsel %vm697_vm2, %v3329_v57, 0.0 }
 0x78e   : > { %v3920_v58 = vpop.eup %3330 }
 0x78f   : > { %v1890_v15 = vsel %vm697_vm2, %v3920_v58, 0.0  ;;  %v3924_v13 = vpop.eup %3332 }
 0x790   : > { %1891 = vadd.xlane.f32.xlu1 %v1890_v15  ;;  %1876 = vadd.xlane.f32.xlu0 %v1875_v2  ;;  %v1884_v6 = vsel %vm697_vm2, %v3924_v13, 0.0  ;;  %v3386_v2 = vld [vmem:[%s3501_s17] sm:$0xff]  }
 0x792   : > { %v3927_v16 = vpop.eup %3334 }
 0x793   : > { %v1893_v27 = vsel %vm697_vm2, %v3927_v16, 0.0  ;;  %v3337_v18 = vpop.eup %3336 }
 0x794   : > { %1885 = vadd.xlane.f32.xlu1 %v1884_v6  ;;  %1894 = vadd.xlane.f32.xlu0 %v1893_v27  ;;  %v1887_v19 = vsel %vm697_vm2, %v3337_v18, 0.0 }
 0x798   : > { %1888 = vadd.xlane.f32.xlu0 %v1887_v19  ;;  %v3387_v19 = vld [vmem:[%s3501_s17 + $0x8] sm:$0xff]  }
 0x7a5   : > { %1920 = vrot.lane.b32.xlu1 %v3528_v36, %s3408_s23 }
 0x7a9   : > { %1922 = vrot.lane.b32.xlu1 %v3526_v34, %s3408_s23 }
 0x7ae   : > { %1918 = vrot.lane.b32.xlu0 %v3514_v17, %s3408_s23 }
 0x7c6   : > { %v3061_v29 = vpop.f32.mrb[24].mxu1 }
 0x7c7   : > { %v1595_v30 = vpop.f32.mrb[25].mxu1 }
 0x7c8   : > { %v3062_v37 = vpop.f32.mrb[26].mxu1 }
 0x7c9   : > { %v1627_v53 = vpack.c.bf16 %v3062_v37, %v3061_v29  ;;  %v1598_v55 = vpop.f32.mrb[27].mxu1  ;;  %v452_v29 = vunpack.c.l.bf16 %v3387_v19 }
 0x7ca   : > { %v1626_v56 = vpack.c.bf16 %v1598_v55, %v1595_v30 }
 0x7cc   : > { %3069 = vmatprep.mubr.msk.bf16.mxu1 %vm607_vm1, %v1626_v56 }
 0x7cd   : > { %3070 = vmatmul.mubr.msk.bf16.vlgmr.msra.gmra.mrb[16].mxu1 %vm607_vm1, %v1627_v53 }
 0x7ce   : > { %3094 = vmatpush3.bf16.msra.mxu1 %v1917_v8  ;;  %v3065_v38 = vpop.f32.mrb[28].mxu1 }
 0x7cf   : > { %v1611_v3 = vpop.f32.mrb[29].mxu1 }
 0x7d0   : > { %v3066_v36 = vpop.f32.mrb[30].mxu1 }
 0x7d1   : > { %v1629_v9 = vpack.c.bf16 %v3066_v36, %v3065_v38  ;;  %v1614_v25 = vpop.f32.mrb[31].mxu1 }
 0x7d2   : > { %v1628_v34 = vpack.c.bf16 %v1614_v25, %v1611_v3  ;;  %v453_v3 = vunpack.c.h.bf16 %v3387_v19 }
 0x7d4   : > { %3073 = vmatprep.mubr.msk.bf16.mxu1 %vm607_vm1, %v1628_v34 }
 0x7d5   : > { %3074 = vmatmul.mubr.msk.bf16.gmra.mrb[20].mxu1 %vm607_vm1, %v1629_v9 }
 0x815   : > { %v1880_v17 = vpop.xlane.xlu1 %1879 }
 0x819   : > { %v1874_v26 = vpop.xlane.xlu1 %1873  ;;  %v1883_v31 = vpop.xlane.xlu0 %1882 }
 0x81a   : > { %3338 = vrcp.f32 %v1874_v26 }
 0x81d   : > { %v1892_v32 = vpop.xlane.xlu1 %1891  ;;  %v1877_v33 = vpop.xlane.xlu0 %1876 }
 0x81e   : > { %3340 = vrcp.f32 %v1877_v33 }
 0x81f   : > { %3342 = vrcp.f32 %v1883_v31  ;;  %v3388_v31 = vld [vmem:[%s3501_s17 + $0x10] sm:$0xff]  }
 0x820   : > { %3344 = vrcp.f32 %v1880_v17 }
 0x821   : > { %v1895_v24 = vpop.xlane.xlu0 %1894  ;;  %v1886_v63 = vpop.xlane.xlu1 %1885 }
 0x822   : > { %3346 = vrcp.f32 %v1886_v63 }
 0x824   : > { %v3339_v35 = vpop.eup %3338 }
 0x825   : > { %v1889_v21 = vpop.xlane.xlu0 %1888  ;;  %v1921_v23 = vpop.permute.xlu1 %1920  ;;  %v1904_v7 = vmul.f32 %v3339_v35, %v3325_v47 }
 0x826   : > { %3348 = vrcp.f32 %v1889_v21 }
 0x827   : > { %3350 = vrcp.f32 %v1895_v24  ;;  %v3389_v24 = vld [vmem:[%s3501_s17 + $0x18] sm:$0xff]  }
 0x828   : > { %v3341_v39 = vpop.eup %3340  ;;  %3352 = vrcp.f32 %v1892_v32  ;;  %v454_v32 = vunpack.c.l.bf16 %v3388_v31  ;;  %v456_v63 = vunpack.c.l.bf16 %v3389_v24 }
 0x829   : > { %v1919_v22 = vpop.permute.xlu0 %1918  ;;  %v1905_v28 = vmul.f32 %v3341_v39, %v3329_v57  ;;  %v3343_v41 = vpop.eup %3342 }
 0x82a   : > { %3095 = vmatprep.subr.bf16.mxu1 %v1919_v22  ;;  %v3345_v42 = vpop.eup %3344  ;;  %v1923_v44 = vpop.permute.xlu1 %1922  ;;  %v1907_v46 = vmul.f32 %v3343_v41, %v3915_v49 }
 0x82b   : > { %3096 = vmatpush3.bf16.msra.mxu1 %v1919_v22  ;;  %v1912_v40 = vpack.c.bf16 %v1905_v28, %v1904_v7  ;;  %v1906_v60 = vmul.f32 %v3345_v42, %v3911_v51  ;;  %v455_v22 = vunpack.c.h.bf16 %v3388_v31  ;;  %v457_v42 = vunpack.c.h.bf16 %v3389_v24  ;;  %v3216_v31 = vld [vmem:[%s4194_s7] sm:$0xff]  }
 0x82c   : > { %3097 = vmatprep.subr.bf16.mxu1 %v1921_v23  ;;  %v3347_v43 = vpop.eup %3346  ;;  %3119 = vmatprep.subr.bf16.mxu0 %v3216_v31 }
 0x82d   : > { %3101 = vmatprep.mubr.msk.bf16.mxu1 %vm697_vm2, %v1912_v40  ;;  %v1908_v62 = vmul.f32 %v3347_v43, %v3924_v13  ;;  %v1913_v61 = vpack.c.bf16 %v1907_v46, %v1906_v60  ;;  %v2794_v13 = vld [vmem:[%s4191_s4] ss:$0 sm:$0xff]  ;;  %3120 = vmatpush3.bf16.msra.mxu0 %v3216_v31 }
 0x82f   : > { %3098 = vmatpush3.bf16.msra.mxu1 %v1921_v23 }
 0x830   : > { %v3349_v45 = vpop.eup %3348  ;;  %3099 = vmatprep.subr.bf16.mxu1 %v1923_v44 }
 0x831   : > { %v1909_v20 = vmul.f32 %v3349_v45, %v3337_v18  ;;  %v3351_v1 = vpop.eup %3350  ;;  %v451_v18 = vunpack.c.h.bf16 %v3386_v2 }
 0x832   : > { %v3353_v12 = vpop.eup %3352  ;;  %v1911_v5 = vmul.f32 %v3351_v1, %v3927_v16  ;;  %v450_v16 = vunpack.c.l.bf16 %v3386_v2 }
 0x833   : > { %3100 = vmatpush3.bf16.msra.mxu1 %v1923_v44  ;;  %v1914_v4 = vpack.c.bf16 %v1909_v20, %v1908_v62  ;;  %v1910_v8 = vmul.f32 %v3353_v12, %v3920_v58 }
 0x834   : > { %3190 = vmatprep.subr.msk.bf16.mxu1 %vm1191_vm3, %v2009_v59 }
 0x835   : > { %v1915_v11 = vpack.c.bf16 %v1911_v5, %v1910_v8 }
 0x836   : > { %3102 = vmatmul.mubr.msk.bf16.vlgmr.msra.gmra.mrb[32].mxu1 %vm697_vm2, %v1913_v61 }
 0x837   : > { %3105 = vmatprep.mubr.msk.bf16.mxu1 %vm697_vm2, %v1914_v4  ;;  %3110 = vmatpush3.bf16.msra.mxu1 %v2023_v0 }
 0x83e   : > { %3106 = vmatmul.mubr.msk.bf16.gmra.mrb[36].mxu1 %vm697_vm2, %v1915_v11 }
 0x909   : > { %v3103_v48 = vpop.f32.mrb[32].mxu1 }
 0x90a   : > { %v1974_v51 = vpop.f32.mrb[33].mxu1 }
 0x90b   : > { %v3104_v52 = vpop.f32.mrb[34].mxu1 }
 0x90c   : > { %v2006_v14 = vpack.c.bf16 %v3104_v52, %v3103_v48  ;;  %v1977_v10 = vpop.f32.mrb[35].mxu1 }
 0x90d   : > { %v2005_v47 = vpack.c.bf16 %v1977_v10, %v1974_v51 }
 0x90f   : > { %3111 = vmatprep.mubr.msk.bf16.mxu1 %vm607_vm1, %v2005_v47 }
 0x910   : > { %3112 = vmatmul.mubr.msk.bf16.vlgmr.msra.gmra.mrb[16].mxu1 %vm607_vm1, %v2006_v14 }
 0x911   : > { %v3107_v49 = vpop.f32.mrb[36].mxu1 }
 0x912   : > { %v1990_v50 = vpop.f32.mrb[37].mxu1 }
 0x913   : > { %v3108_v54 = vpop.f32.mrb[38].mxu1 }
 0x914   : > { %v2008_v57 = vpack.c.bf16 %v3108_v54, %v3107_v49  ;;  %v1993_v58 = vpop.f32.mrb[39].mxu1 }
 0x915   : > { %v2007_v15 = vpack.c.bf16 %v1993_v58, %v1990_v50 }
 0x917   : > { %3115 = vmatprep.mubr.msk.bf16.mxu1 %vm607_vm1, %v2007_v15 }
 0x918   : > { %3116 = vmatmul.mubr.msk.bf16.gmra.mrb[20].mxu1 %vm607_vm1, %v2008_v57 }
 0x9e3   : > { %v3113_v6 = vpop.f32.mrb[16].mxu1 }
 0x9e4   : > { %v2059_v27 = vpop.f32.mrb[17].mxu1  ;;  %v2107_v30 = vadd.f32 %v3113_v6, %v2794_v13 }
 0x9e5   : > { %v2105_v37 = vadd.f32 %v2794_v13, %v2059_v27  ;;  %v3114_v53 = vpop.f32.mrb[18].mxu1 }
 0x9e6   : > { %v2062_v55 = vpop.f32.mrb[19].mxu1  ;;  %v2108_v36 = vadd.f32 %v3114_v53, %v2794_v13  ;;  %v2115_v9 = vadd.f32 %v2107_v30, %v452_v29 }
 0x9e7   : > { %v2113_v56 = vadd.f32 %v2105_v37, %v450_v16  ;;  %v2106_v38 = vadd.f32 %v2794_v13, %v2062_v55 }
 0x9e8   : > { %v2116_v33 = vadd.f32 %v2108_v36, %v453_v3  ;;  %v2129_v7 = vsel %vm501_vm0, %v2115_v9, 0.0 }
 0x9e9   : > { %v2114_v25 = vadd.f32 %v2106_v38, %v451_v18  ;;  %v2123_v34 = vsel %vm501_vm0, %v2113_v56, 0.0 }
 0x9ea   : > { %2124 = vadd.xlane.f32.xlu0 %v2123_v34  ;;  %v2132_v43 = vsel %vm501_vm0, %v2116_v33, 0.0 }
 0x9eb   : > { %v3117_v17 = vpop.f32.mrb[20].mxu1  ;;  %v2126_v26 = vsel %vm501_vm0, %v2114_v25, 0.0 }
 0x9ec   : > { %2127 = vadd.xlane.f32.xlu1 %v2126_v26  ;;  %v2075_v21 = vpop.f32.mrb[21].mxu1  ;;  %v2111_v35 = vadd.f32 %v3117_v17, %v2794_v13 }
 0x9ed   : > { %v2109_v39 = vadd.f32 %v2794_v13, %v2075_v21  ;;  %v3118_v23 = vpop.f32.mrb[22].mxu1 }
 0x9ee   : > { %v2078_v28 = vpop.f32.mrb[23].mxu1  ;;  %2130 = vadd.xlane.f32.xlu0 %v2129_v7  ;;  %v2119_v44 = vadd.f32 %v2111_v35, %v456_v63  ;;  %v2112_v45 = vadd.f32 %v3118_v23, %v2794_v13 }
 0x9ef   : > { %v2117_v40 = vadd.f32 %v2109_v39, %v454_v32  ;;  %v2110_v41 = vadd.f32 %v2794_v13, %v2078_v28  ;;  %v3217_v32 = vld [vmem:[%s4194_s7 + $0x8] sm:$0xff]  }
 0x9f0   : > { %v2120_v59 = vadd.f32 %v2112_v45, %v457_v42  ;;  %v2141_v60 = vsel %vm501_vm0, %v2119_v44, 0.0  ;;  %3121 = vmatprep.subr.bf16.mxu0 %v3217_v32 }
 0x9f1   : > { %v2118_v46 = vadd.f32 %v2110_v41, %v455_v22  ;;  %v2135_v20 = vsel %vm501_vm0, %v2117_v40, 0.0  ;;  %3122 = vmatpush3.bf16.msra.mxu0 %v3217_v32 }
 0x9f2   : > { %2136 = vadd.xlane.f32.xlu1 %v2135_v20  ;;  %2133 = vadd.xlane.f32.xlu0 %v2132_v43  ;;  %v2144_v61 = vsel %vm501_vm0, %v2120_v59, 0.0 }
 0x9f3   : > { %v2138_v62 = vsel %vm501_vm0, %v2118_v46, 0.0 }
 0x9f6   : > { %2142 = vadd.xlane.f32.xlu1 %v2141_v60  ;;  %2139 = vadd.xlane.f32.xlu0 %v2138_v62 }
 0x9fa   : > { %2145 = vadd.xlane.f32.xlu0 %v2144_v61  ;;  %v2795_v61 = vld [vmem:[%s4192_s5] ss:$0 sm:$0xff] }
 0xa77   : > { %v2125_v0 = vpop.xlane.xlu0 %2124 }
 0xa78   : > { %v2148_v1 = vmul.f32 0.03125, %v2125_v0 }
 0xa79   : > { %v2128_v4 = vpop.xlane.xlu1 %2127 }
 0xa7a   : > { %v3977_v12 = vsub.f32 %v2113_v56, %v2148_v1  ;;  %v2149_v5 = vmul.f32 0.03125, %v2128_v4 }
 0xa7b   : > { %v2131_v8 = vpop.xlane.xlu0 %2130 }
 0xa7c   : > { %v3979_v11 = vsub.f32 %v2114_v25, %v2149_v5  ;;  %v2150_v48 = vmul.f32 0.03125, %v2131_v8  ;;  %v2164_v51 = vmul.f32 %v3977_v12, %v3977_v12 }
 0xa7e   : > { %v3983_v52 = vsub.f32 %v2115_v9, %v2150_v48  ;;  %v2172_v14 = vsel %vm501_vm0, %v2164_v51, 0.0  ;;  %v2165_v10 = vmul.f32 %v3979_v11, %v3979_v11 }
 0xa7f   : > { %v2137_v47 = vpop.xlane.xlu1 %2136  ;;  %2173 = vadd.xlane.f32.xlu1 %v2172_v14  ;;  %v2134_v49 = vpop.xlane.xlu0 %2133 }
 0xa80   : > { %v2152_v50 = vmul.f32 0.03125, %v2137_v47  ;;  %v2151_v54 = vmul.f32 0.03125, %v2134_v49  ;;  %v2175_v57 = vsel %vm501_vm0, %v2165_v10, 0.0  ;;  %v2166_v58 = vmul.f32 %v3983_v52, %v3983_v52  ;;  %v2796_v47 = vld [vmem:[%s4193_s6] ss:$0 sm:$0xff] }
 0xa81   : > { %2176 = vadd.xlane.f32.xlu0 %v2175_v57 }
 0xa82   : > { %v3991_v15 = vsub.f32 %v2117_v40, %v2152_v50  ;;  %v3993_v13 = vsub.f32 %v2116_v33, %v2151_v54  ;;  %v2178_v2 = vsel %vm501_vm0, %v2166_v58, 0.0  ;;  %v4026_v33 = vld [vmem:[%s4196_s9] sm:$0xff]  }
 0xa83   : > { %v2143_v16 = vpop.xlane.xlu1 %2142  ;;  %2179 = vadd.xlane.f32.xlu1 %v2178_v2  ;;  %v2140_v6 = vpop.xlane.xlu0 %2139  ;;  %3131 = vmatprep.subr.bf16.mxu0 %v4026_v33 }
 0xa84   : > { %v2154_v27 = vmul.f32 0.03125, %v2143_v16  ;;  %v2153_v18 = vmul.f32 0.03125, %v2140_v6  ;;  %v2168_v19 = vmul.f32 %v3991_v15, %v3991_v15  ;;  %v2167_v29 = vmul.f32 %v3993_v13, %v3993_v13 }
 0xa86   : > { %v4000_v30 = vsub.f32 %v2119_v44, %v2154_v27  ;;  %v4002_v37 = vsub.f32 %v2118_v46, %v2153_v18  ;;  %v2184_v53 = vsel %vm501_vm0, %v2168_v19, 0.0  ;;  %v2181_v55 = vsel %vm501_vm0, %v2167_v29, 0.0 }
 0xa87   : > { %2185 = vadd.xlane.f32.xlu1 %v2184_v53  ;;  %2182 = vadd.xlane.f32.xlu0 %v2181_v55  ;;  %v2146_v56 = vpop.xlane.xlu0 %2145 }
 0xa88   : > { %v2155_v38 = vmul.f32 0.03125, %v2146_v56  ;;  %v2170_v3 = vmul.f32 %v4000_v30, %v4000_v30  ;;  %v2169_v36 = vmul.f32 %v4002_v37, %v4002_v37 }
 0xa8a   : > { %v4010_v9 = vsub.f32 %v2120_v59, %v2155_v38  ;;  %v2190_v25 = vsel %vm501_vm0, %v2170_v3, 0.0  ;;  %v2187_v34 = vsel %vm501_vm0, %v2169_v36, 0.0 }
 0xa8b   : > { %2191 = vadd.xlane.f32.xlu1 %v2190_v25  ;;  %2188 = vadd.xlane.f32.xlu0 %v2187_v34 }
 0xa8c   : > { %v2171_v17 = vmul.f32 %v4010_v9, %v4010_v9 }
 0xa8e   : > { %v2193_v26 = vsel %vm501_vm0, %v2171_v17, 0.0 }
 0xa8f   : > { %2194 = vadd.xlane.f32.xlu0 %v2193_v26 }
 0xb0c   : > { %v2174_v24 = vpop.xlane.xlu1 %2173 }
 0xb0d   : > { %v2196_v63 = vmul.f32 0.03125, %v2174_v24  ;;  %v3221_v24 = vld [vmem:[%s4196_s9 + $0x18] sm:$0xff]  }
 0xb0e   : > { %v2177_v21 = vpop.xlane.xlu0 %2176 }
 0xb0f   : > { %v2204_v35 = vadd.f32 1e-05, %v2196_v63  ;;  %v2197_v39 = vmul.f32 0.03125, %v2177_v21  ;;  %v2797_v63 = vld [vmem:[%s4195_s8] ss:$0 sm:$0xff] }
 0xb10   : > { %v2180_v23 = vpop.xlane.xlu1 %2179 }
 0xb11   : > { %3354 = vrsqrt.f32 %v2204_v35  ;;  %v2205_v22 = vadd.f32 1e-05, %v2197_v39  ;;  %v2198_v7 = vmul.f32 0.03125, %v2180_v23 }
 0xb13   : > { %3356 = vrsqrt.f32 %v2205_v22  ;;  %v2206_v28 = vadd.f32 1e-05, %v2198_v7 }
 0xb14   : > { %v2186_v40 = vpop.xlane.xlu1 %2185  ;;  %v2183_v41 = vpop.xlane.xlu0 %2182 }
 0xb15   : > { %3358 = vrsqrt.f32 %v2206_v28  ;;  %v2200_v42 = vmul.f32 0.03125, %v2186_v40  ;;  %v2199_v43 = vmul.f32 0.03125, %v2183_v41 }
 0xb17   : > { %v2208_v44 = vadd.f32 1e-05, %v2200_v42  ;;  %v2207_v45 = vadd.f32 1e-05, %v2199_v43 }
 0xb18   : > { %v2192_v46 = vpop.xlane.xlu1 %2191  ;;  %v2189_v20 = vpop.xlane.xlu0 %2188 }
 0xb19   : > { %3360 = vrsqrt.f32 %v2208_v44  ;;  %v2202_v59 = vmul.f32 0.03125, %v2192_v46  ;;  %v2201_v60 = vmul.f32 0.03125, %v2189_v20 }
 0xb1a   : > { %3362 = vrsqrt.f32 %v2207_v45 }
 0xb1b   : > { %v3355_v62 = vpop.eup %3354  ;;  %v2210_v0 = vadd.f32 1e-05, %v2202_v59  ;;  %v2209_v1 = vadd.f32 1e-05, %v2201_v60 }
 0xb1c   : > { %v2220_v4 = vmul.f32 %v3355_v62, %v3977_v12  ;;  %v2195_v5 = vpop.xlane.xlu0 %2194 }
 0xb1d   : > { %v3357_v8 = vpop.eup %3356  ;;  %3364 = vrsqrt.f32 %v2210_v0  ;;  %v2203_v48 = vmul.f32 0.03125, %v2195_v5 }
 0xb1e   : > { %v2221_v51 = vmul.f32 %v3357_v8, %v3979_v11  ;;  %3366 = vrsqrt.f32 %v2209_v1  ;;  %v2234_v14 = vmul.f32 %v2795_v61, %v2220_v4 }
 0xb1f   : > { %v3359_v10 = vpop.eup %3358  ;;  %v2211_v49 = vadd.f32 1e-05, %v2203_v48 }
 0xb20   : > { %v2235_v50 = vmul.f32 %v2795_v61, %v2221_v51  ;;  %v2222_v54 = vmul.f32 %v3359_v10, %v3983_v52  ;;  %v4038_v57 = vadd.f32 %v2796_v47, %v2234_v14 }
 0xb21   : > { %3368 = vrsqrt.f32 %v2211_v49 }
 0xb22   : > { %v4040_v12 = vadd.f32 %v2796_v47, %v2235_v50  ;;  %v2236_v16 = vmul.f32 %v2795_v61, %v2222_v54 }
 0xb23   : > { %v3361_v58 = vpop.eup %3360 }
 0xb24   : > { %v3363_v2 = vpop.eup %3362  ;;  %v2256_v11 = vpack.c.bf16 %v4040_v12, %v4038_v57  ;;  %v2224_v6 = vmul.f32 %v3361_v58, %v3991_v15  ;;  %v4048_v53 = vadd.f32 %v2796_v47, %v2236_v16 }
 0xb25   : > { %v2223_v27 = vmul.f32 %v3363_v2, %v3993_v13  ;;  %v3219_v13 = vld [vmem:[%s4196_s9 + $0x8] sm:$0xff]  }
 0xb26   : > { %3123 = vmatprep.mubr.msk.bf16.mxu0 %vm501_vm0, %v2256_v11  ;;  %v2238_v38 = vmul.f32 %v2795_v61, %v2224_v6 }
 0xb27   : > { %v3365_v18 = vpop.eup %3364  ;;  %v2237_v19 = vmul.f32 %v2795_v61, %v2223_v27 }
 0xb28   : > { %v3367_v52 = vpop.eup %3366  ;;  %v2226_v29 = vmul.f32 %v3365_v18, %v4000_v30  ;;  %v4060_v30 = vadd.f32 %v2796_v47, %v2238_v38 }
 0xb29   : > { %v4050_v55 = vadd.f32 %v2796_v47, %v2237_v19  ;;  %v2225_v56 = vmul.f32 %v3367_v52, %v4002_v37 }
 0xb2a   : > { %v2240_v34 = vmul.f32 %v2795_v61, %v2226_v29 }
 0xb2b   : > { %v3369_v3 = vpop.eup %3368  ;;  %v2257_v15 = vpack.c.bf16 %v4050_v55, %v4048_v53  ;;  %v2239_v36 = vmul.f32 %v2795_v61, %v2225_v56 }
 0xb2c   : > { %v2227_v25 = vmul.f32 %v3369_v3, %v4010_v9  ;;  %v4067_v31 = vadd.f32 %v2796_v47, %v2240_v34 }
 0xb2d   : > { %3124 = vmatmul.mubr.msk.bf16.vlgmr.msra.gmra.mrb[40].mxu0 %vm501_vm0, %v2257_v15  ;;  %v4062_v17 = vadd.f32 %v2796_v47, %v2239_v36 }
 0xb2e   : > { %v2241_v37 = vmul.f32 %v2795_v61, %v2227_v25  ;;  %3132 = vmatpush3.bf16.msra.mxu0 %v4026_v33  ;;  %v3220_v33 = vld [vmem:[%s4196_s9 + $0x10] sm:$0xff]  }
 0xb2f   : > { %v2258_v26 = vpack.c.bf16 %v4062_v17, %v4060_v30  ;;  %3133 = vmatprep.subr.bf16.mxu0 %v3219_v13 }
 0xb30   : > { %v4069_v32 = vadd.f32 %v2796_v47, %v2241_v37  ;;  %v2804_v47 = vld [vmem:[%s4197_s10] ss:$0 sm:$0xff] }
 0xb31   : > { %3127 = vmatprep.mubr.msk.bf16.mxu0 %vm501_vm0, %v2258_v26 }
 0xb32   : > { %v2259_v9 = vpack.c.bf16 %v4069_v32, %v4067_v31  ;;  %3134 = vmatpush3.bf16.msra.mxu0 %v3219_v13 }
 0xb33   : > { %3135 = vmatprep.subr.bf16.mxu0 %v3220_v33 }
 0xb35   : > { %3128 = vmatmul.mubr.msk.bf16.gmra.mrb[44].mxu0 %vm501_vm0, %v2259_v9 }
 0xb36   : > { %3136 = vmatpush3.bf16.msra.mxu0 %v3220_v33 }
 0xb37   : > { %3137 = vmatprep.subr.bf16.mxu0 %v3221_v24 }
 0xb3a   : > { %3138 = vmatpush3.bf16.msra.mxu0 %v3221_v24 }
 0xc00   : > { %v3125_v21 = vpop.f32.mrb[40].mxu0 }
 0xc01   : > { %v2338_v35 = vadd.f32 %v3125_v21, %v2797_v63  ;;  %v2329_v39 = vpop.f32.mrb[41].mxu0 }
 0xc02   : > { %v2330_v23 = vadd.f32 %v2797_v63, %v2329_v39  ;;  %v3126_v22 = vpop.f32.mrb[42].mxu0 }
 0xc03   : > { %v2341_v7 = vadd.f32 %v3126_v22, %v2797_v63  ;;  %v2332_v28 = vpop.f32.mrb[43].mxu0  ;;  %v2362_v41 = vmax.f32 %v2338_v35, 0.0 }
 0xc04   : > { %v2333_v40 = vadd.f32 %v2797_v63, %v2332_v28  ;;  %v2360_v43 = vmax.f32 %v2330_v23, 0.0 }
 0xc05   : > { %v2363_v42 = vmax.f32 %v2341_v7, 0.0 }
 0xc06   : > { %v2361_v44 = vmax.f32 %v2333_v40, 0.0 }
 0xc07   : > { %v2369_v45 = vpack.c.bf16 %v2363_v42, %v2362_v41 }
 0xc08   : > { %v2368_v46 = vpack.c.bf16 %v2361_v44, %v2360_v43  ;;  %v3129_v20 = vpop.f32.mrb[44].mxu0 }
 0xc09   : > { %v2354_v59 = vadd.f32 %v3129_v20, %v2797_v63  ;;  %v2345_v60 = vpop.f32.mrb[45].mxu0 }
 0xc0a   : > { %v2346_v62 = vadd.f32 %v2797_v63, %v2345_v60  ;;  %v3130_v61 = vpop.f32.mrb[46].mxu0  ;;  %3139 = vmatprep.mubr.msk.bf16.mxu0 %vm697_vm2, %v2368_v46 }
 0xc0b   : > { %v2357_v0 = vadd.f32 %v3130_v61, %v2797_v63  ;;  %v2348_v1 = vpop.f32.mrb[47].mxu0  ;;  %3140 = vmatmul.mubr.msk.bf16.vlgmr.msra.gmra.mrb[48].mxu0 %vm697_vm2, %v2369_v45  ;;  %v2366_v5 = vmax.f32 %v2354_v59, 0.0 }
 0xc0c   : > { %v2349_v4 = vadd.f32 %v2797_v63, %v2348_v1  ;;  %v2364_v48 = vmax.f32 %v2346_v62, 0.0 }
 0xc0d   : > { %v2367_v8 = vmax.f32 %v2357_v0, 0.0 }
 0xc0e   : > { %v2365_v51 = vmax.f32 %v2349_v4, 0.0 }
 0xc0f   : > { %v2371_v14 = vpack.c.bf16 %v2367_v8, %v2366_v5 }
 0xc10   : > { %v2370_v10 = vpack.c.bf16 %v2365_v51, %v2364_v48 }
 0xc12   : > { %3143 = vmatprep.mubr.msk.bf16.mxu0 %vm697_vm2, %v2370_v10 }
 0xc13   : > { %3144 = vmatmul.mubr.msk.bf16.gmra.mrb[52].mxu0 %vm697_vm2, %v2371_v14 }
 0xcde   : > { %v3141_v49 = vpop.f32.mrb[48].mxu0 }
 0xcdf   : > { %v2466_v50 = vadd.f32 %v3141_v49, %v2804_v47  ;;  %v2457_v54 = vpop.f32.mrb[49].mxu0 }
 0xce0   : > { %v2458_v58 = vadd.f32 %v2804_v47, %v2457_v54  ;;  %v3142_v2 = vpop.f32.mrb[50].mxu0 }
 0xce1   : > { %v2490_v11 = vadd.f32 %v2466_v50, %v4048_v53  ;;  %v2469_v16 = vadd.f32 %v3142_v2, %v2804_v47  ;;  %v2460_v6 = vpop.f32.mrb[51].mxu0 }
 0xce2   : > { %v2461_v27 = vadd.f32 %v2804_v47, %v2460_v6  ;;  %v2488_v18 = vadd.f32 %v2458_v58, %v4038_v57 }
 0xce3   : > { %v2491_v19 = vadd.f32 %v2469_v16, %v4050_v55  ;;  %v2504_v52 = vsel %vm501_vm0, %v2490_v11, 0.0 }
 0xce4   : > { %2505 = vadd.xlane.f32.xlu1 %v2504_v52  ;;  %v2489_v29 = vadd.f32 %v2461_v27, %v4040_v12  ;;  %v2498_v15 = vsel %vm501_vm0, %v2488_v18, 0.0 }
 0xce5   : > { %v2507_v56 = vsel %vm501_vm0, %v2491_v19, 0.0 }
 0xce6   : > { %2508 = vadd.xlane.f32.xlu0 %v2507_v56  ;;  %v3145_v38 = vpop.f32.mrb[52].mxu0  ;;  %v2501_v57 = vsel %vm501_vm0, %v2489_v29, 0.0 }
 0xce7   : > { %v2473_v3 = vpop.f32.mrb[53].mxu0  ;;  %v2482_v53 = vadd.f32 %v3145_v38, %v2804_v47 }
 0xce8   : > { %v2474_v36 = vadd.f32 %v2804_v47, %v2473_v3  ;;  %2499 = vadd.xlane.f32.xlu1 %v2498_v15  ;;  %v3146_v13 = vpop.f32.mrb[54].mxu0 }
 0xce9   : > { %v2476_v25 = vpop.f32.mrb[55].mxu0  ;;  %v2485_v34 = vadd.f32 %v3146_v13, %v2804_v47  ;;  %v2494_v12 = vadd.f32 %v2482_v53, %v4067_v31 }
 0xcea   : > { %v2492_v55 = vadd.f32 %v2474_v36, %v4060_v30  ;;  %v2477_v37 = vadd.f32 %v2804_v47, %v2476_v25  ;;  %2502 = vadd.xlane.f32.xlu0 %v2501_v57 }
 0xceb   : > { %v2495_v33 = vadd.f32 %v2485_v34, %v4069_v32  ;;  %v2516_v63 = vsel %vm501_vm0, %v2494_v12, 0.0 }
 0xcec   : > { %v2493_v26 = vadd.f32 %v2477_v37, %v4062_v17  ;;  %v2510_v9 = vsel %vm501_vm0, %v2492_v55, 0.0 }
 0xced   : > { %2511 = vadd.xlane.f32.xlu1 %v2510_v9  ;;  %v2519_v30 = vsel %vm501_vm0, %v2495_v33, 0.0 }
 0xcee   : > { %v2513_v24 = vsel %vm501_vm0, %v2493_v26, 0.0 }
 0xcef   : > { %2514 = vadd.xlane.f32.xlu0 %v2513_v24  ;;  %v2813_v24 = vld [vmem:[%s4198_s11] ss:$0 sm:$0xff] }
 0xcf1   : > { %2517 = vadd.xlane.f32.xlu1 %v2516_v63 }
 0xcf3   : > { %2520 = vadd.xlane.f32.xlu0 %v2519_v30 }
 0xd71   : > { %v2506_v21 = vpop.xlane.xlu1 %2505 }
 0xd72   : > { %v2524_v35 = vmul.f32 0.03125, %v2506_v21 }
 0xd73   : > { %v2509_v39 = vpop.xlane.xlu0 %2508 }
 0xd74   : > { %v4107_v31 = vsub.f32 %v2490_v11, %v2524_v35  ;;  %v2525_v17 = vmul.f32 0.03125, %v2509_v39 }
 0xd75   : > { %v2500_v23 = vpop.xlane.xlu1 %2499 }
 0xd76   : > { %v4109_v22 = vsub.f32 %v2491_v19, %v2525_v17  ;;  %v2522_v7 = vmul.f32 0.03125, %v2500_v23  ;;  %v2540_v32 = vmul.f32 %v4107_v31, %v4107_v31  ;;  %v2814_v17 = vld [vmem:[%s4199_s12] ss:$0 sm:$0xff] }
 0xd77   : > { %v2503_v28 = vpop.xlane.xlu0 %2502 }
 0xd78   : > { %v4113_v40 = vsub.f32 %v2488_v18, %v2522_v7  ;;  %v2523_v41 = vmul.f32 0.03125, %v2503_v28  ;;  %v2552_v42 = vsel %vm501_vm0, %v2540_v32, 0.0  ;;  %v2541_v43 = vmul.f32 %v4109_v22, %v4109_v22 }
 0xd79   : > { %2553 = vadd.xlane.f32.xlu1 %v2552_v42 }
 0xd7a   : > { %v4118_v44 = vsub.f32 %v2489_v29, %v2523_v41  ;;  %v2512_v45 = vpop.xlane.xlu1 %2511  ;;  %v2555_v46 = vsel %vm501_vm0, %v2541_v43, 0.0  ;;  %v2538_v20 = vmul.f32 %v4113_v40, %v4113_v40 }
 0xd7b   : > { %v2526_v59 = vmul.f32 0.03125, %v2512_v45  ;;  %2556 = vadd.xlane.f32.xlu0 %v2555_v46 }
 0xd7c   : > { %v2515_v60 = vpop.xlane.xlu0 %2514  ;;  %v2546_v62 = vsel %vm501_vm0, %v2538_v20, 0.0  ;;  %v2539_v61 = vmul.f32 %v4118_v44, %v4118_v44 }
 0xd7d   : > { %v4126_v0 = vsub.f32 %v2492_v55, %v2526_v59  ;;  %v2527_v1 = vmul.f32 0.03125, %v2515_v60  ;;  %2547 = vadd.xlane.f32.xlu1 %v2546_v62 }
 0xd7e   : > { %v2518_v4 = vpop.xlane.xlu1 %2517  ;;  %v2549_v5 = vsel %vm501_vm0, %v2539_v61, 0.0 }
 0xd7f   : > { %v4129_v8 = vsub.f32 %v2493_v26, %v2527_v1  ;;  %v2528_v48 = vmul.f32 0.03125, %v2518_v4  ;;  %2550 = vadd.xlane.f32.xlu0 %v2549_v5  ;;  %v2542_v51 = vmul.f32 %v4126_v0, %v4126_v0 }
 0xd80   : > { %v2521_v14 = vpop.xlane.xlu0 %2520 }
 0xd81   : > { %v4133_v10 = vsub.f32 %v2494_v12, %v2528_v48  ;;  %v2529_v47 = vmul.f32 0.03125, %v2521_v14  ;;  %v2558_v49 = vsel %vm501_vm0, %v2542_v51, 0.0  ;;  %v2543_v50 = vmul.f32 %v4129_v8, %v4129_v8 }
 0xd82   : > { %2559 = vadd.xlane.f32.xlu1 %v2558_v49 }
 0xd83   : > { %v4138_v54 = vsub.f32 %v2495_v33, %v2529_v47  ;;  %v2561_v58 = vsel %vm501_vm0, %v2543_v50, 0.0  ;;  %v2544_v2 = vmul.f32 %v4133_v10, %v4133_v10 }
 0xd84   : > { %2562 = vadd.xlane.f32.xlu0 %v2561_v58 }
 0xd85   : > { %v2564_v11 = vsel %vm501_vm0, %v2544_v2, 0.0  ;;  %v2545_v16 = vmul.f32 %v4138_v54, %v4138_v54 }
 0xd86   : > { %2565 = vadd.xlane.f32.xlu1 %v2564_v11 }
 0xd87   : > { %v2567_v6 = vsel %vm501_vm0, %v2545_v16, 0.0 }
 0xd88   : > { %2568 = vadd.xlane.f32.xlu0 %v2567_v6 }
 0xe06   : > { %v2554_v27 = vpop.xlane.xlu1 %2553 }
 0xe07   : > { %v2572_v18 = vmul.f32 0.03125, %v2554_v27 }
 0xe08   : > { %v2557_v19 = vpop.xlane.xlu0 %2556 }
 0xe09   : > { %v2580_v52 = vadd.f32 1e-05, %v2572_v18  ;;  %v2573_v29 = vmul.f32 0.03125, %v2557_v19 }
 0xe0a   : > { %v2548_v56 = vpop.xlane.xlu1 %2547 }
 0xe0b   : > { %3370 = vrsqrt.f32 %v2580_v52  ;;  %v2581_v38 = vadd.f32 1e-05, %v2573_v29  ;;  %v2570_v3 = vmul.f32 0.03125, %v2548_v56 }
 0xe0c   : > { %v2551_v15 = vpop.xlane.xlu0 %2550 }
 0xe0d   : > { %3372 = vrsqrt.f32 %v2581_v38  ;;  %v2578_v53 = vadd.f32 1e-05, %v2570_v3  ;;  %v2571_v36 = vmul.f32 0.03125, %v2551_v15 }
 0xe0f   : > { %3374 = vrsqrt.f32 %v2578_v53  ;;  %v2579_v13 = vadd.f32 1e-05, %v2571_v36  ;;  %v2560_v25 = vpop.xlane.xlu1 %2559 }
 0xe10   : > { %v2574_v57 = vmul.f32 0.03125, %v2560_v25 }
 0xe11   : > { %3376 = vrsqrt.f32 %v2579_v13  ;;  %v2563_v55 = vpop.xlane.xlu0 %2562 }
 0xe12   : > { %v2582_v34 = vadd.f32 1e-05, %v2574_v57  ;;  %v2575_v37 = vmul.f32 0.03125, %v2563_v55 }
 0xe13   : > { %v2566_v12 = vpop.xlane.xlu1 %2565 }
 0xe14   : > { %3378 = vrsqrt.f32 %v2582_v34  ;;  %v2583_v26 = vadd.f32 1e-05, %v2575_v37  ;;  %v2576_v9 = vmul.f32 0.03125, %v2566_v12 }
 0xe15   : > { %v3371_v33 = vpop.eup %3370  ;;  %v2569_v63 = vpop.xlane.xlu0 %2568 }
 0xe16   : > { %v2596_v30 = vmul.f32 %v3371_v33, %v4107_v31  ;;  %3380 = vrsqrt.f32 %v2583_v26  ;;  %v2584_v21 = vadd.f32 1e-05, %v2576_v9  ;;  %v2577_v35 = vmul.f32 0.03125, %v2569_v63 }
 0xe17   : > { %v3373_v39 = vpop.eup %3372 }
 0xe18   : > { %v2610_v23 = vmul.f32 %v2813_v24, %v2596_v30  ;;  %v2597_v7 = vmul.f32 %v3373_v39, %v4109_v22  ;;  %3382 = vrsqrt.f32 %v2584_v21  ;;  %v2585_v32 = vadd.f32 1e-05, %v2577_v35 }
 0xe19   : > { %v3375_v28 = vpop.eup %3374 }
 0xe1a   : > { %v2624_v41 = vadd.f32 %v2814_v17, %v2610_v23  ;;  %v2611_v42 = vmul.f32 %v2813_v24, %v2597_v7  ;;  %v2594_v43 = vmul.f32 %v3375_v28, %v4113_v40  ;;  %3384 = vrsqrt.f32 %v2585_v32 }
 0xe1b   : > { %v3377_v31 = vpop.eup %3376 }
 0xe1c   : > { %v2829_v45 = vpack.c.bf16 %v2624_v41, %v2624_v41  ;;  %v2625_v22 = vadd.f32 %v2814_v17, %v2611_v42  ;;  %v2608_v46 = vmul.f32 %v2813_v24, %v2594_v43  ;;  %v2595_v20 = vmul.f32 %v3377_v31, %v4118_v44 }
 0xe1e   : > { %v3379_v59 = vpop.eup %3378  ;;  %2665 = vst.msk [vmem:[%s4161_s28 + $0x8] sm:$0xf] %vm2662_vm4, %v2829_v45  ;;  %v2830_v40 = vpack.c.bf16 %v2625_v22, %v2625_v22  ;;  %v2622_v60 = vadd.f32 %v2814_v17, %v2608_v46  ;;  %v2609_v62 = vmul.f32 %v2813_v24, %v2595_v20 }
 0xe1f   : > { %v2598_v61 = vmul.f32 %v3379_v59, %v4126_v0 }
 0xe20   : > { %v3381_v1 = vpop.eup %3380  ;;  %2666 = vst.msk [vmem:[%s4161_s28 + $0xc] sm:$0xf] %vm2662_vm4, %v2830_v40  ;;  %v2827_v4 = vpack.c.bf16 %v2622_v60, %v2622_v60  ;;  %v2623_v5 = vadd.f32 %v2814_v17, %v2609_v62 }
 0xe21   : > { %v2612_v48 = vmul.f32 %v2813_v24, %v2598_v61  ;;  %v2599_v51 = vmul.f32 %v3381_v1, %v4129_v8 }
 0xe22   : > { %v3383_v14 = vpop.eup %3382  ;;  %2663 = vst.msk [vmem:[%s4161_s28] sm:$0xf] %vm2662_vm4, %v2827_v4  ;;  %v2828_v44 = vpack.c.bf16 %v2623_v5, %v2623_v5 }
 0xe23   : > { %v2626_v47 = vadd.f32 %v2814_v17, %v2612_v48  ;;  %v2613_v49 = vmul.f32 %v2813_v24, %v2599_v51  ;;  %v2600_v50 = vmul.f32 %v3383_v14, %v4133_v10 }
 0xe24   : > { %v3385_v0 = vpop.eup %3384  ;;  %2664 = vst.msk [vmem:[%s4161_s28 + $0x4] sm:$0xf] %vm2662_vm4, %v2828_v44 }
 0xe25   : > { %v2831_v58 = vpack.c.bf16 %v2626_v47, %v2626_v47  ;;  %v2627_v2 = vadd.f32 %v2814_v17, %v2613_v49  ;;  %v2614_v11 = vmul.f32 %v2813_v24, %v2600_v50  ;;  %v2601_v16 = vmul.f32 %v3385_v0, %v4138_v54 }
 0xe27   : > { %2667 = vst.msk [vmem:[%s4161_s28 + $0x10] sm:$0xf] %vm2662_vm4, %v2831_v58  ;;  %v2832_v8 = vpack.c.bf16 %v2627_v2, %v2627_v2  ;;  %v2628_v6 = vadd.f32 %v2814_v17, %v2614_v11  ;;  %v2615_v27 = vmul.f32 %v2813_v24, %v2601_v16 }
 0xe29   : > { %2668 = vst.msk [vmem:[%s4161_s28 + $0x14] sm:$0xf] %vm2662_vm4, %v2832_v8  ;;  %v2833_v18 = vpack.c.bf16 %v2628_v6, %v2628_v6  ;;  %v2629_v19 = vadd.f32 %v2814_v17, %v2615_v27 }
 0xe2b   : > { %2669 = vst.msk [vmem:[%s4161_s28 + $0x18] sm:$0xf] %vm2662_vm4, %v2833_v18  ;;  %v2834_v10 = vpack.c.bf16 %v2629_v19, %v2629_v19 }
 0xe2d   : > { %2670 = vst.msk [vmem:[%s4161_s28 + $0x1c] sm:$0xf] %vm2662_vm4, %v2834_v10 }
 0xe2e PF: > { %s23_s25 = sadd.s32 1, %s3396_s25  }
 0xe2f   : > { %p20_p4 = scmp.ge.s32.totalorder %s23_s25, 4  }
 0xe31   :  { %22 = sbr.rel (!%p20_p4) target bundleno = 1 (0x1), region = 102 }

</bundles_post_ra>
